<compile_context>
chip_gen: v5e
topology: v5e:2x2
jax: 0.10.0
libtpu: 0.0.40
codegen_flags: <defaults>
</compile_context>

<pallas_src>
import jax
import jax.numpy as jnp
from jax import lax
from jax.experimental import pallas as pl
from jax.experimental.pallas import tpu as pltpu

_BIAS_PAD = 16  # bf16 sublane packing: keep packed-row count a multiple of 16


# ----------------------------------------------------------------------------
# Kernels
# ----------------------------------------------------------------------------
def _resident_kernel(s0_ref, xi_ref, w_ref, out_ref):
    """Whole horizon resident in VMEM; grid = (batch_tiles,)."""
    # s0_ref : [tb, Ds]       f32
    # xi_ref : [T1, tb, Dx]   bf16  (full horizon, VMEM-resident)
    # w_ref  : [T1, R,  Ds]   bf16  (full horizon, VMEM-resident), R=Ds+Dx+PAD
    # out_ref: [tb, Ds]       f32   (carries the state across the time loop)
    T1, tb, Dx = xi_ref.shape
    Ds = out_ref.shape[1]
    pad = w_ref.shape[1] - Ds - Dx
    cdt = w_ref.dtype

    out_ref[...] = s0_ref[...]

    # Constant "bias selector" block (column 0 ones): folds beff into the
    # single merged matmul.  Hoisted out of the time loop.
    bias_onehot = (lax.broadcasted_iota(jnp.int32, (tb, pad), 1) == 0).astype(cdt)

    def step(t, carry):
        # Single K = Ds+Dx+pad MXU push per step (fills the 256-deep MXU on
        # v6e/v7x).  State stays f32 in out_ref; bf16 cast is MXU-input only.
        xcat = jnp.concatenate(
            [out_ref[...].astype(cdt), xi_ref[t], bias_onehot], axis=-1)
        out_ref[...] = jnp.dot(xcat, w_ref[t],
                               preferred_element_type=jnp.float32)
        return carry

    lax.fori_loop(0, T1, step, 0, unroll=(T1 <= 16))


def _streamed_kernel(s0_ref, xi_ref, w_ref, out_ref):
    """Fallback: grid = (batch_tiles, T1); time is the inner sequential axis."""
    # xi_ref: [tb, Dx] (time squeezed), w_ref: [R, Ds], out_ref carries state.
    t = pl.program_id(1)
    tb, Dx = xi_ref.shape
    Ds = out_ref.shape[1]
    pad = w_ref.shape[0] - Ds - Dx
    cdt = w_ref.dtype

    @pl.when(t == 0)
    def _():
        out_ref[...] = s0_ref[...]

    bias_onehot = (lax.broadcasted_iota(jnp.int32, (tb, pad), 1) == 0).astype(cdt)
    xcat = jnp.concatenate(
        [out_ref[...].astype(cdt), xi_ref[...], bias_onehot], axis=-1)
    out_ref[...] = jnp.dot(xcat, w_ref[...], preferred_element_type=jnp.float32)


# ----------------------------------------------------------------------------
# Host-side wrapper
# ----------------------------------------------------------------------------
def _pack_params(wa, ba, wfs, wfa, wfx, bf, param_dtype):
    """Exact affine fusion of A_t into F_t + row-wise packing."""
    weff = wfs + jnp.einsum('tij,tjk->tik', wa, wfa)           # (T1, Ds, Ds)
    beff = jnp.einsum('tij,tjk->tik', ba, wfa) + bf            # (T1, 1,  Ds)
    T1, Ds, _ = weff.shape
    # Pad bias to a 16-row group -> packed rows stay sublane-aligned (bf16).
    bias_block = jnp.concatenate(
        [beff, jnp.zeros((T1, _BIAS_PAD - 1, Ds), beff.dtype)], axis=1)
    wpack = jnp.concatenate([weff, wfx, bias_block], axis=1).astype(param_dtype)
    return wpack                                               # (T1, R, Ds)


def propagator_forward(s0, xis, wa, ba, wfs, wfa, wfx, bf, *,
                       batch_tile=256, param_dtype=jnp.bfloat16,
                       force_streamed=False):
    """Pallas Propagator.forward: returns s_{T+1} of shape [B, Ds] (float32)."""
    T1, B, Dx = xis.shape
    _, Ds = s0.shape
    s0 = s0.astype(jnp.float32)
    if T1 == 0:                       # degenerate Propagator with no steps
        return s0

    wpack = _pack_params(wa, ba, wfs, wfa, wfx, bf, param_dtype)
    R = Ds + Dx + _BIAS_PAD
    xis_c = xis.astype(param_dtype)
    p = jnp.dtype(param_dtype).itemsize

    # --- batch tiling: big tiles amortize weight traffic; force >= 2 tiles
    #     when B permits so both v7x TensorCores get work (noop on v5e/v6e).
    tb = min(batch_tile, B)
    if B >= 16 and pl.cdiv(B, tb) < 2:
        tb = min(B, ((-(-B // 2) + 7) // 8) * 8)   # ceil(B/2), sublane-aligned
    nb = pl.cdiv(B, tb)

    # --- per-core VMEM budget (generation-aware) ----------------------------
    try:
        vmem_cap = int(pltpu.get_tpu_info().vmem_capacity_bytes)
    except Exception:
        vmem_cap = 64 << 20           # conservative: v7x per-TensorCore VMEM
    usable = max(vmem_cap - (16 << 20), 32 << 20)

    state_bytes = 2 * (tb * Ds * 4) * 2                     # s0 + out (x2 buf)
    resident_need = (2 * (T1 * R * Ds * p)                  # packed weights
                     + 2 * (T1 * tb * Dx * p)               # full-horizon xi
                     + state_bytes)
    streamed_need = (2 * (R * Ds * p) + 2 * (tb * Dx * p) + state_bytes)

    def _limit(need):
        return int(min(usable, max(int(need * 1.3) + (2 << 20), 8 << 20)))

    use_resident = (not force_streamed) and \
        (int(resident_need * 1.3) + (2 << 20) <= usable)

    if use_resident:
        grid_spec = pltpu.PrefetchScalarGridSpec(
            num_scalar_prefetch=0,
            grid=(nb,),                                      # batch-parallel only
            in_specs=[
                pl.BlockSpec((tb, Ds), lambda b: (b, 0)),          # s_0 tile
                pl.BlockSpec((T1, tb, Dx), lambda b: (0, b, 0)),   # xi horizon
                pl.BlockSpec((T1, R, Ds), lambda b: (0, 0, 0)),    # all params
            ],
            out_specs=pl.BlockSpec((tb, Ds), lambda b: (b, 0)),
        )
        return pl.pallas_call(
            _resident_kernel,
            grid_spec=grid_spec,
            out_shape=jax.ShapeDtypeStruct((B, Ds), jnp.float32),
            compiler_params=pltpu.CompilerParams(
                dimension_semantics=("parallel",),
                vmem_limit_bytes=_limit(resident_need),
            ),
        )(s0, xis_c, wpack)

    # Streamed fallback: one packed-weight + xi block per (batch, time) step.
    grid_spec = pltpu.PrefetchScalarGridSpec(
        num_scalar_prefetch=0,
        grid=(nb, T1),
        in_specs=[
            pl.BlockSpec((tb, Ds), lambda b, t: (b, 0)),           # s_0 tile
            pl.BlockSpec((None, tb, Dx), lambda b, t: (t, b, 0)),  # xi_{t+1}
            pl.BlockSpec((None, R, Ds), lambda b, t: (t, 0, 0)),   # packed params
        ],
        # Constant block index over t -> resident in VMEM -> carries the state.
        out_specs=pl.BlockSpec((tb, Ds), lambda b, t: (b, 0)),
    )
    return pl.pallas_call(
        _streamed_kernel,
        grid_spec=grid_spec,
        out_shape=jax.ShapeDtypeStruct((B, Ds), jnp.float32),
        compiler_params=pltpu.CompilerParams(
            dimension_semantics=("parallel", "arbitrary"),
            vmem_limit_bytes=_limit(streamed_need),
        ),
    )(s0, xis_c, wpack)


def propagator_reference(s0, xis, wa, ba, wfs, wfa, wfx, bf):
    """Pure-JAX f32 reference mirroring Propagator.propagate / forward (unfused)."""
    s = s0
    for t in range(xis.shape[0]):
        a = s @ wa[t] + ba[t]                                  # A_t(s_t)
        s = s @ wfs[t] + a @ wfa[t] + xis[t] @ wfx[t] + bf[t]  # F_t(s_t,a_t,xi)
    return s


if __name__ == "__main__":
    # Lane-dense shapes (feature dims multiples of 128) so the merged matmul
    # has K = 272 (fills the 256-deep MXU) and output stores are full-lane.
    B, Ds, Da, Dx, T1 = 256, 128, 64, 128, 8

    key = jax.random.PRNGKey(0)
    ks = jax.random.split(key, 8)

    s0 = jax.random.normal(ks[0], (B, Ds), jnp.float32)
    xis = jax.random.normal(ks[1], (T1, B, Dx), jnp.float32)  # (xi_t)_{t=1}^{T+1}

    # Deterministic per-timestep affine parameters (synthetic "checkpoint").
    # 1/sqrt(D) scaling keeps the state evolution O(1) over the horizon.
    scale = 0.5 / float(Ds) ** 0.5
    wa = scale * jax.random.normal(ks[2], (T1, Ds, Da), jnp.float32)
    ba = scale * jax.random.normal(ks[3], (T1, 1, Da), jnp.float32)
    wfs = scale * jax.random.normal(ks[4], (T1, Ds, Ds), jnp.float32)
    wfa = scale * jax.random.normal(ks[5], (T1, Da, Ds), jnp.float32)
    wfx = scale * jax.random.normal(ks[6], (T1, Dx, Ds), jnp.float32)
    bf = scale * jax.random.normal(ks[7], (T1, 1, Ds), jnp.float32)

    ref = propagator_reference(s0, xis, wa, ba, wfs, wfa, wfx, bf)

    # Resident-weights path (default for these shapes).
    out_res = jax.block_until_ready(
        propagator_forward(s0, xis, wa, ba, wfs, wfa, wfx, bf))
    # Streamed fallback path (exercised explicitly for coverage).
    out_str = jax.block_until_ready(
        propagator_forward(s0, xis, wa, ba, wfs, wfa, wfx, bf,
                           force_streamed=True))

    assert out_res.shape == (B, Ds)
    # bf16 parameters => loosened tolerance vs the unfused f32 reference.
    assert jnp.allclose(out_res, ref, atol=5e-2, rtol=5e-2), "resident mismatch"
    assert jnp.allclose(out_str, ref, atol=5e-2, rtol=5e-2), "streamed mismatch"
    assert jnp.allclose(out_res, out_str, atol=1e-3, rtol=1e-3), "path mismatch"

    print("KERNEL_OK")
</pallas_src>

<mosaic_0001>
module attributes {stable_mosaic.version = 11 : i64} {
  func.func @_resident_kernel(%arg0: i32, %arg1: memref<128x128xf32, #tpu.memory_space<vmem>>, %arg2: memref<8x128x128xbf16, #tpu.memory_space<vmem>>, %arg3: memref<8x272x128xbf16, #tpu.memory_space<vmem>>, %arg4: memref<128x128xf32, #tpu.memory_space<vmem>>) attributes {dimension_semantics = [#tpu.dimension_semantics<parallel>], iteration_bounds = array<i64: 2>, scalar_prefetch = 0 : i64, scratch_operands = 0 : i64, tpu.core_type = #tpu.core_type<tc>, window_params = [{transform_indices = @transform_0, window_bounds = array<i64: 128, 128>}, {transform_indices = @transform_1, window_bounds = array<i64: 8, 128, 128>}, {pipeline_mode = #tpu.pipeline_mode<synchronous>, transform_indices = @transform_2, window_bounds = array<i64: 8, 272, 128>}, {transform_indices = @transform_3, window_bounds = array<i64: 128, 128>}]} {
    %c0 = arith.constant 0 : index
    %c0_0 = arith.constant 0 : index
    %0 = vector.load %arg1[%c0, %c0_0] : memref<128x128xf32, #tpu.memory_space<vmem>>, vector<128x128xf32>
    %c0_1 = arith.constant 0 : index
    %c0_2 = arith.constant 0 : index
    %1 = vector.load %arg4[%c0_1, %c0_2] : memref<128x128xf32, #tpu.memory_space<vmem>>, vector<128x128xf32>
    tpu.vector_store %arg4[%c0_1, %c0_2], %0 {strides = array<i32>} : memref<128x128xf32, #tpu.memory_space<vmem>>, vector<128x128xf32>,
    %2 = tpu.iota {dimensions = array<i32: 1>} : vector<128x16xi32>
    %c0_i32 = arith.constant 0 : i32
    %3 = vector.broadcast %c0_i32 : i32 to vector<128x16xi32>
    %4 = arith.cmpi eq, %2, %3 : vector<128x16xi32>
    %5 = arith.extui %4 : vector<128x16xi1> to vector<128x16xi32>
    %6 = arith.sitofp %5 : vector<128x16xi32> to vector<128x16xf32>
    %7 = arith.truncf %6 : vector<128x16xf32> to vector<128x16xbf16>
    %c0_i32_3 = arith.constant 0 : i32
    %c0_4 = arith.constant 0 : index
    %c0_5 = arith.constant 0 : index
    %8 = vector.load %arg4[%c0_4, %c0_5] : memref<128x128xf32, #tpu.memory_space<vmem>>, vector<128x128xf32>
    %9 = arith.truncf %8 : vector<128x128xf32> to vector<128x128xbf16>
    %10 = arith.index_cast %c0_i32_3 : i32 to index
    %c0_6 = arith.constant 0 : index
    %c0_7 = arith.constant 0 : index
    %11 = vector.load %arg2[%10, %c0_6, %c0_7] : memref<8x128x128xbf16, #tpu.memory_space<vmem>>, vector<1x128x128xbf16>
    %12 = vector.shape_cast %11 : vector<1x128x128xbf16> to vector<128x128xbf16>
    %13 = tpu.concatenate %9, %12, %7 in 1 : vector<128x128xbf16>, vector<128x128xbf16>, vector<128x16xbf16> -> vector<128x272xbf16>
    %14 = arith.index_cast %c0_i32_3 : i32 to index
    %c0_8 = arith.constant 0 : index
    %c0_9 = arith.constant 0 : index
    %15 = vector.load %arg3[%14, %c0_8, %c0_9] : memref<8x272x128xbf16, #tpu.memory_space<vmem>>, vector<1x272x128xbf16>
    %16 = vector.shape_cast %15 : vector<1x272x128xbf16> to vector<272x128xbf16>
    %cst = arith.constant dense<0.000000e+00> : vector<128x128xf32>
    %17 = tpu.matmul %13, %16, %cst {dimension_numbers = #tpu.dot_dimension_numbers<[1], [0], [0], [1], [0, 0, 1, 1], [], []>} : vector<128x272xbf16>, vector<272x128xbf16>, vector<128x128xf32> -> vector<128x128xf32>
    %c0_10 = arith.constant 0 : index
    %c0_11 = arith.constant 0 : index
    %18 = vector.load %arg4[%c0_10, %c0_11] : memref<128x128xf32, #tpu.memory_space<vmem>>, vector<128x128xf32>
    tpu.vector_store %arg4[%c0_10, %c0_11], %17 {strides = array<i32>} : memref<128x128xf32, #tpu.memory_space<vmem>>, vector<128x128xf32>,
    %c1_i32 = arith.constant 1 : i32
    %c0_12 = arith.constant 0 : index
    %c0_13 = arith.constant 0 : index
    %19 = vector.load %arg4[%c0_12, %c0_13] : memref<128x128xf32, #tpu.memory_space<vmem>>, vector<128x128xf32>
    %20 = arith.truncf %19 : vector<128x128xf32> to vector<128x128xbf16>
    %21 = arith.index_cast %c1_i32 : i32 to index
    %c0_14 = arith.constant 0 : index
    %c0_15 = arith.constant 0 : index
    %22 = vector.load %arg2[%21, %c0_14, %c0_15] : memref<8x128x128xbf16, #tpu.memory_space<vmem>>, vector<1x128x128xbf16>
    %23 = vector.shape_cast %22 : vector<1x128x128xbf16> to vector<128x128xbf16>
    %24 = tpu.concatenate %20, %23, %7 in 1 : vector<128x128xbf16>, vector<128x128xbf16>, vector<128x16xbf16> -> vector<128x272xbf16>
    %25 = arith.index_cast %c1_i32 : i32 to index
    %c0_16 = arith.constant 0 : index
    %c0_17 = arith.constant 0 : index
    %26 = vector.load %arg3[%25, %c0_16, %c0_17] : memref<8x272x128xbf16, #tpu.memory_space<vmem>>, vector<1x272x128xbf16>
    %27 = vector.shape_cast %26 : vector<1x272x128xbf16> to vector<272x128xbf16>
    %cst_18 = arith.constant dense<0.000000e+00> : vector<128x128xf32>
    %28 = tpu.matmul %24, %27, %cst_18 {dimension_numbers = #tpu.dot_dimension_numbers<[1], [0], [0], [1], [0, 0, 1, 1], [], []>} : vector<128x272xbf16>, vector<272x128xbf16>, vector<128x128xf32> -> vector<128x128xf32>
    %c0_19 = arith.constant 0 : index
    %c0_20 = arith.constant 0 : index
    %29 = vector.load %arg4[%c0_19, %c0_20] : memref<128x128xf32, #tpu.memory_space<vmem>>, vector<128x128xf32>
    tpu.vector_store %arg4[%c0_19, %c0_20], %28 {strides = array<i32>} : memref<128x128xf32, #tpu.memory_space<vmem>>, vector<128x128xf32>,
    %c2_i32 = arith.constant 2 : i32
    %c0_21 = arith.constant 0 : index
    %c0_22 = arith.constant 0 : index
    %30 = vector.load %arg4[%c0_21, %c0_22] : memref<128x128xf32, #tpu.memory_space<vmem>>, vector<128x128xf32>
    %31 = arith.truncf %30 : vector<128x128xf32> to vector<128x128xbf16>
    %32 = arith.index_cast %c2_i32 : i32 to index
    %c0_23 = arith.constant 0 : index
    %c0_24 = arith.constant 0 : index
    %33 = vector.load %arg2[%32, %c0_23, %c0_24] : memref<8x128x128xbf16, #tpu.memory_space<vmem>>, vector<1x128x128xbf16>
    %34 = vector.shape_cast %33 : vector<1x128x128xbf16> to vector<128x128xbf16>
    %35 = tpu.concatenate %31, %34, %7 in 1 : vector<128x128xbf16>, vector<128x128xbf16>, vector<128x16xbf16> -> vector<128x272xbf16>
    %36 = arith.index_cast %c2_i32 : i32 to index
    %c0_25 = arith.constant 0 : index
    %c0_26 = arith.constant 0 : index
    %37 = vector.load %arg3[%36, %c0_25, %c0_26] : memref<8x272x128xbf16, #tpu.memory_space<vmem>>, vector<1x272x128xbf16>
    %38 = vector.shape_cast %37 : vector<1x272x128xbf16> to vector<272x128xbf16>
    %cst_27 = arith.constant dense<0.000000e+00> : vector<128x128xf32>
    %39 = tpu.matmul %35, %38, %cst_27 {dimension_numbers = #tpu.dot_dimension_numbers<[1], [0], [0], [1], [0, 0, 1, 1], [], []>} : vector<128x272xbf16>, vector<272x128xbf16>, vector<128x128xf32> -> vector<128x128xf32>
    %c0_28 = arith.constant 0 : index
    %c0_29 = arith.constant 0 : index
    %40 = vector.load %arg4[%c0_28, %c0_29] : memref<128x128xf32, #tpu.memory_space<vmem>>, vector<128x128xf32>
    tpu.vector_store %arg4[%c0_28, %c0_29], %39 {strides = array<i32>} : memref<128x128xf32, #tpu.memory_space<vmem>>, vector<128x128xf32>,
    %c3_i32 = arith.constant 3 : i32
    %c0_30 = arith.constant 0 : index
    %c0_31 = arith.constant 0 : index
    %41 = vector.load %arg4[%c0_30, %c0_31] : memref<128x128xf32, #tpu.memory_space<vmem>>, vector<128x128xf32>
    %42 = arith.truncf %41 : vector<128x128xf32> to vector<128x128xbf16>
    %43 = arith.index_cast %c3_i32 : i32 to index
    %c0_32 = arith.constant 0 : index
    %c0_33 = arith.constant 0 : index
    %44 = vector.load %arg2[%43, %c0_32, %c0_33] : memref<8x128x128xbf16, #tpu.memory_space<vmem>>, vector<1x128x128xbf16>
    %45 = vector.shape_cast %44 : vector<1x128x128xbf16> to vector<128x128xbf16>
    %46 = tpu.concatenate %42, %45, %7 in 1 : vector<128x128xbf16>, vector<128x128xbf16>, vector<128x16xbf16> -> vector<128x272xbf16>
    %47 = arith.index_cast %c3_i32 : i32 to index
    %c0_34 = arith.constant 0 : index
    %c0_35 = arith.constant 0 : index
    %48 = vector.load %arg3[%47, %c0_34, %c0_35] : memref<8x272x128xbf16, #tpu.memory_space<vmem>>, vector<1x272x128xbf16>
    %49 = vector.shape_cast %48 : vector<1x272x128xbf16> to vector<272x128xbf16>
    %cst_36 = arith.constant dense<0.000000e+00> : vector<128x128xf32>
    %50 = tpu.matmul %46, %49, %cst_36 {dimension_numbers = #tpu.dot_dimension_numbers<[1], [0], [0], [1], [0, 0, 1, 1], [], []>} : vector<128x272xbf16>, vector<272x128xbf16>, vector<128x128xf32> -> vector<128x128xf32>
    %c0_37 = arith.constant 0 : index
    %c0_38 = arith.constant 0 : index
    %51 = vector.load %arg4[%c0_37, %c0_38] : memref<128x128xf32, #tpu.memory_space<vmem>>, vector<128x128xf32>
    tpu.vector_store %arg4[%c0_37, %c0_38], %50 {strides = array<i32>} : memref<128x128xf32, #tpu.memory_space<vmem>>, vector<128x128xf32>,
    %c4_i32 = arith.constant 4 : i32
    %c0_39 = arith.constant 0 : index
    %c0_40 = arith.constant 0 : index
    %52 = vector.load %arg4[%c0_39, %c0_40] : memref<128x128xf32, #tpu.memory_space<vmem>>, vector<128x128xf32>
    %53 = arith.truncf %52 : vector<128x128xf32> to vector<128x128xbf16>
    %54 = arith.index_cast %c4_i32 : i32 to index
    %c0_41 = arith.constant 0 : index
    %c0_42 = arith.constant 0 : index
    %55 = vector.load %arg2[%54, %c0_41, %c0_42] : memref<8x128x128xbf16, #tpu.memory_space<vmem>>, vector<1x128x128xbf16>
    %56 = vector.shape_cast %55 : vector<1x128x128xbf16> to vector<128x128xbf16>
    %57 = tpu.concatenate %53, %56, %7 in 1 : vector<128x128xbf16>, vector<128x128xbf16>, vector<128x16xbf16> -> vector<128x272xbf16>
    %58 = arith.index_cast %c4_i32 : i32 to index
    %c0_43 = arith.constant 0 : index
    %c0_44 = arith.constant 0 : index
    %59 = vector.load %arg3[%58, %c0_43, %c0_44] : memref<8x272x128xbf16, #tpu.memory_space<vmem>>, vector<1x272x128xbf16>
    %60 = vector.shape_cast %59 : vector<1x272x128xbf16> to vector<272x128xbf16>
    %cst_45 = arith.constant dense<0.000000e+00> : vector<128x128xf32>
    %61 = tpu.matmul %57, %60, %cst_45 {dimension_numbers = #tpu.dot_dimension_numbers<[1], [0], [0], [1], [0, 0, 1, 1], [], []>} : vector<128x272xbf16>, vector<272x128xbf16>, vector<128x128xf32> -> vector<128x128xf32>
    %c0_46 = arith.constant 0 : index
    %c0_47 = arith.constant 0 : index
    %62 = vector.load %arg4[%c0_46, %c0_47] : memref<128x128xf32, #tpu.memory_space<vmem>>, vector<128x128xf32>
    tpu.vector_store %arg4[%c0_46, %c0_47], %61 {strides = array<i32>} : memref<128x128xf32, #tpu.memory_space<vmem>>, vector<128x128xf32>,
    %c5_i32 = arith.constant 5 : i32
    %c0_48 = arith.constant 0 : index
    %c0_49 = arith.constant 0 : index
    %63 = vector.load %arg4[%c0_48, %c0_49] : memref<128x128xf32, #tpu.memory_space<vmem>>, vector<128x128xf32>
    %64 = arith.truncf %63 : vector<128x128xf32> to vector<128x128xbf16>
    %65 = arith.index_cast %c5_i32 : i32 to index
    %c0_50 = arith.constant 0 : index
    %c0_51 = arith.constant 0 : index
    %66 = vector.load %arg2[%65, %c0_50, %c0_51] : memref<8x128x128xbf16, #tpu.memory_space<vmem>>, vector<1x128x128xbf16>
    %67 = vector.shape_cast %66 : vector<1x128x128xbf16> to vector<128x128xbf16>
    %68 = tpu.concatenate %64, %67, %7 in 1 : vector<128x128xbf16>, vector<128x128xbf16>, vector<128x16xbf16> -> vector<128x272xbf16>
    %69 = arith.index_cast %c5_i32 : i32 to index
    %c0_52 = arith.constant 0 : index
    %c0_53 = arith.constant 0 : index
    %70 = vector.load %arg3[%69, %c0_52, %c0_53] : memref<8x272x128xbf16, #tpu.memory_space<vmem>>, vector<1x272x128xbf16>
    %71 = vector.shape_cast %70 : vector<1x272x128xbf16> to vector<272x128xbf16>
    %cst_54 = arith.constant dense<0.000000e+00> : vector<128x128xf32>
    %72 = tpu.matmul %68, %71, %cst_54 {dimension_numbers = #tpu.dot_dimension_numbers<[1], [0], [0], [1], [0, 0, 1, 1], [], []>} : vector<128x272xbf16>, vector<272x128xbf16>, vector<128x128xf32> -> vector<128x128xf32>
    %c0_55 = arith.constant 0 : index
    %c0_56 = arith.constant 0 : index
    %73 = vector.load %arg4[%c0_55, %c0_56] : memref<128x128xf32, #tpu.memory_space<vmem>>, vector<128x128xf32>
    tpu.vector_store %arg4[%c0_55, %c0_56], %72 {strides = array<i32>} : memref<128x128xf32, #tpu.memory_space<vmem>>, vector<128x128xf32>,
    %c6_i32 = arith.constant 6 : i32
    %c0_57 = arith.constant 0 : index
    %c0_58 = arith.constant 0 : index
    %74 = vector.load %arg4[%c0_57, %c0_58] : memref<128x128xf32, #tpu.memory_space<vmem>>, vector<128x128xf32>
    %75 = arith.truncf %74 : vector<128x128xf32> to vector<128x128xbf16>
    %76 = arith.index_cast %c6_i32 : i32 to index
    %c0_59 = arith.constant 0 : index
    %c0_60 = arith.constant 0 : index
    %77 = vector.load %arg2[%76, %c0_59, %c0_60] : memref<8x128x128xbf16, #tpu.memory_space<vmem>>, vector<1x128x128xbf16>
    %78 = vector.shape_cast %77 : vector<1x128x128xbf16> to vector<128x128xbf16>
    %79 = tpu.concatenate %75, %78, %7 in 1 : vector<128x128xbf16>, vector<128x128xbf16>, vector<128x16xbf16> -> vector<128x272xbf16>
    %80 = arith.index_cast %c6_i32 : i32 to index
    %c0_61 = arith.constant 0 : index
    %c0_62 = arith.constant 0 : index
    %81 = vector.load %arg3[%80, %c0_61, %c0_62] : memref<8x272x128xbf16, #tpu.memory_space<vmem>>, vector<1x272x128xbf16>
    %82 = vector.shape_cast %81 : vector<1x272x128xbf16> to vector<272x128xbf16>
    %cst_63 = arith.constant dense<0.000000e+00> : vector<128x128xf32>
    %83 = tpu.matmul %79, %82, %cst_63 {dimension_numbers = #tpu.dot_dimension_numbers<[1], [0], [0], [1], [0, 0, 1, 1], [], []>} : vector<128x272xbf16>, vector<272x128xbf16>, vector<128x128xf32> -> vector<128x128xf32>
    %c0_64 = arith.constant 0 : index
    %c0_65 = arith.constant 0 : index
    %84 = vector.load %arg4[%c0_64, %c0_65] : memref<128x128xf32, #tpu.memory_space<vmem>>, vector<128x128xf32>
    tpu.vector_store %arg4[%c0_64, %c0_65], %83 {strides = array<i32>} : memref<128x128xf32, #tpu.memory_space<vmem>>, vector<128x128xf32>,
    %c7_i32 = arith.constant 7 : i32
    %c0_66 = arith.constant 0 : index
    %c0_67 = arith.constant 0 : index
    %85 = vector.load %arg4[%c0_66, %c0_67] : memref<128x128xf32, #tpu.memory_space<vmem>>, vector<128x128xf32>
    %86 = arith.truncf %85 : vector<128x128xf32> to vector<128x128xbf16>
    %87 = arith.index_cast %c7_i32 : i32 to index
    %c0_68 = arith.constant 0 : index
    %c0_69 = arith.constant 0 : index
    %88 = vector.load %arg2[%87, %c0_68, %c0_69] : memref<8x128x128xbf16, #tpu.memory_space<vmem>>, vector<1x128x128xbf16>
    %89 = vector.shape_cast %88 : vector<1x128x128xbf16> to vector<128x128xbf16>
    %90 = tpu.concatenate %86, %89, %7 in 1 : vector<128x128xbf16>, vector<128x128xbf16>, vector<128x16xbf16> -> vector<128x272xbf16>
    %91 = arith.index_cast %c7_i32 : i32 to index
    %c0_70 = arith.constant 0 : index
    %c0_71 = arith.constant 0 : index
    %92 = vector.load %arg3[%91, %c0_70, %c0_71] : memref<8x272x128xbf16, #tpu.memory_space<vmem>>, vector<1x272x128xbf16>
    %93 = vector.shape_cast %92 : vector<1x272x128xbf16> to vector<272x128xbf16>
    %cst_72 = arith.constant dense<0.000000e+00> : vector<128x128xf32>
    %94 = tpu.matmul %90, %93, %cst_72 {dimension_numbers = #tpu.dot_dimension_numbers<[1], [0], [0], [1], [0, 0, 1, 1], [], []>} : vector<128x272xbf16>, vector<272x128xbf16>, vector<128x128xf32> -> vector<128x128xf32>
    %c0_73 = arith.constant 0 : index
    %c0_74 = arith.constant 0 : index
    %95 = vector.load %arg4[%c0_73, %c0_74] : memref<128x128xf32, #tpu.memory_space<vmem>>, vector<128x128xf32>
    tpu.vector_store %arg4[%c0_73, %c0_74], %94 {strides = array<i32>} : memref<128x128xf32, #tpu.memory_space<vmem>>, vector<128x128xf32>,
    %c8_i32 = arith.constant 8 : i32
    return
  }
  func.func @transform_0(%arg0: i32) -> (i32, i32) {
    %c0_i32 = arith.constant 0 : i32
    %c0_i32_0 = arith.constant 0 : i32
    return %arg0, %c0_i32 : i32, i32
  }
  func.func @transform_1(%arg0: i32) -> (i32, i32, i32) {
    %c0_i32 = arith.constant 0 : i32
    %c0_i32_0 = arith.constant 0 : i32
    %c0_i32_1 = arith.constant 0 : i32
    return %c0_i32, %arg0, %c0_i32_0 : i32, i32, i32
  }
  func.func @transform_2(%arg0: i32) -> (i32, i32, i32) {
    %c0_i32 = arith.constant 0 : i32
    %c0_i32_0 = arith.constant 0 : i32
    %c0_i32_1 = arith.constant 0 : i32
    %c0_i32_2 = arith.constant 0 : i32
    return %c0_i32, %c0_i32_0, %c0_i32_1 : i32, i32, i32
  }
  func.func @transform_3(%arg0: i32) -> (i32, i32) {
    %c0_i32 = arith.constant 0 : i32
    %c0_i32_0 = arith.constant 0 : i32
    return %arg0, %c0_i32 : i32, i32
  }
}

</mosaic_0001>

<bundles_post_ra>
// kernel: tpu_custom_call.1
= control target key start
LH: loop header
LB: loop body
LE: loop exit
PB: predicated region body
PF: predicated region fallthrough
CT: control target
= control target key end

     0   :  { %s5851_s0 = inlined_call_operand.hbm [shape: f32[256,128], index: 0, kind: input, shape index: {}]   ;;  %s5852_s1 = inlined_call_operand.hbm [shape: bf16[8,256,128], index: 1, kind: input, shape index: {}]   ;;  %s5853_s2 = inlined_call_operand.hbm [shape: bf16[8,272,128], index: 2, kind: input, shape index: {}]   ;;  %s5854_s3 = inlined_call_operand.hbm [shape: f32[256,128], index: 3, kind: output, shape index: {}]  }
   0x1   :  { %5855 = sst [smem:[#allocation16_spill]] %s5853_s2 }
   0x2   :  { %8 = vsyncpa [#allocation3], 0 }
   0x3   :  { %10 = vsyncpa [#allocation3 + $0x1], 0 }
   0x4   :  { %11 = vsyncpa [#allocation6], 0 }
   0x5   :  { %13 = vsyncpa [#allocation6 + $0x1], 0 }
   0x6   :  { %14 = vsyncpa [#allocation4], 0 }
   0x7   :  { %16 = vsyncpa [#allocation4 + $0x1], 0  ;;  %s5445_s12 = smov 0   ;;  %s5447_s13 = smov 0  }
   0x8   :  { %s5449_s14 = smov 0   ;;  %s5451_s15 = smov 0  }
   0x9 LB: > { %s5466_s16 = sadd.s32 4294967295, %s5409_s15   ;;  %s4001_s17 = sadd.s32 4294967294, %s5409_s15   ;;  %s5409_s15 = sphi %s5451_s15, %s5865_s15   ;;  %s5405_s14 = sphi %s5449_s14, %s5864_s14   ;;  %s5401_s13 = sphi %s5447_s13, %s5863_s13   ;;  %s5397_s12 = sphi %s5445_s12, %s5862_s12  }
   0xa   : > { %s5470_s18 = sadd.s32 1, %s5409_s15   ;;  %s29_s19 = sadd.s32 1, %s5405_s14 }
   0xb   : > { %s26_s20 = ssub.s32 %s5409_s15, %s5470_s18  ;;  %p36_p0 = scmp.ne.s32.totalorder %s5405_s14, %s5401_s13 }
   0xc   : > { %p27_p1 = scmp.eq.s32.totalorder %s26_s20, 0  ;;  %p37_p2 = scmp.eq.s32.totalorder %s5409_s15, 0 }
   0xd   : > { %p42_p3 = scmp.ne.s32.totalorder %s5401_s13, %s5397_s12  ;;  %p43_p4 = scmp.eq.s32.totalorder %s5466_s16, 0 }
   0xe   : > { %s5482_s21 = scalar_select %p27_p1, %s5405_s14, %s29_s19  }
   0xf   : > { %p5484_p5 = por %p37_p2, %p36_p0  ;;  %p5490_p6 = por %p43_p4, %p42_p3 }
  0x10   : > { %p113_p7 = scmp.eq.s32.totalorder %s5466_s16, 1  ;;  %p119_p8 = scmp.eq.s32.totalorder %s4001_s17, 1 }
  0x11   : > { %p4002_p9 = scmp.ge.s32.totalorder %s5409_s15, 1  ;;  %p126_p10 = scmp.lt.s32.totalorder %s5409_s15, 3 }
  0x12   : > { %p5497_p11 = por %p113_p7, %p36_p0  ;;  %p5501_p12 = por %p119_p8, %p42_p3 }
  0x13   : > { %p5505_p13 = pnand %p4002_p9, %p126_p10  ;;  %s5861_s2 = sld [smem:[#allocation16_spill]] }
  0x14   : > { %s5411_s30 = smov [#allocation7]   ;;  %s5412_s5 = smov 64  }
  0x15   : > { %p5220_p1 = pneg %p5505_p13  ;;  %s139_s4 = sshll.u32 %s5411_s30, 4  ;;  %s140_s4 = int_to_ptr.vmem [resolvable:$true] %s139_s4 }
  0x16   : > { %s5413_s6 = smov 4   ;;  %p4004_p2 = scmp.ge.s32.totalorder %s5409_s15, 2 }
  0x17   : > { %p5221_p0 = pnand %p5220_p1, %p43_p4  ;;  %s5520_s7 = sand.u32 (!%p4004_p2), 1, %s5405_s14  }
  0x18   : > { %149 = sbr.rel (%p4004_p2) target bundleno = 56 (0x38), region = 20  ;;  %s5000_s8 = sshll.u32 (!%p4004_p2), %s5409_s15, 7 }
  0x19   : > { %s137_s29 = sshll.u32 %s5861_s2, 4  ;;  %s4005_s9 = sshll.u32 (!%p4004_p2), %s5520_s7, 7  ;;  %s138_s29 = int_to_ptr.hbm [resolvable:$true] %s137_s29 }
  0x1a   : > { %5223 = dma.hbm_to_vmem [thread:$0]  (!%p5221_p0), %s138_s29, 17408, %s140_s4, [#allocation6], %s5412_s5, %s5412_s5, %s5413_s6  }
  0x1b   : > { %s162_s17 = scalar_lea.hbm (!%p4004_p2), %s5851_s0, %s5000_s8  ;;  %s157_s20 = scalar_lea.vmem (!%p4004_p2), [#allocation2], %s4005_s9 }
  0x1c   : > { %s163_s19 = sshll.u32 (!%p4004_p2), %s162_s17, 4  ;;  %s165_s27 = sshll.u32 (!%p4004_p2), %s157_s20, 4  ;;  %s164_s19 = int_to_ptr.hbm [resolvable:$true] %s163_s19  ;;  %s166_s27 = int_to_ptr.vmem [resolvable:$true] %s165_s27 }
  0x1d   : > { %s154_s28 = scalar_lea.sflag [#allocation3], %s5520_s7  ;;  %s5307_s29 = sshra.s32 %s164_s19, 4  ;;  %s5308_s29 = int_to_ptr.hbm [resolvable:$true] %s5307_s29 }
  0x1e   : > { %s5309_s30 = scalar_lea.hbm %s5308_s29, 128  ;;  %s5313_s6 = scalar_lea.hbm %s5851_s0, 256 }
  0x1f   : > { %p5310_p3 = scmp.ne.s32.totalorder %s5308_s29, %s5309_s30  ;;  %p5314_p9 = scmp.lt.s32.totalorder %s5308_s29, %s5851_s0 }
  0x20   : > { %p5315_p10 = scmp.lt.s32.totalorder %s5313_s6, %s5309_s30 }
  0x21   : > { %p5311_p7 = pnand %p5310_p3, %p5484_p5 }
  0x22   : > { %p5316_p1 = por %p5315_p10, %p5314_p9 }
  0x23   : > { %p5312_p8 = pneg %p5311_p7 }
  0x25   : > { %p5317_p0 = pnand %p5316_p1, %p5312_p8 }
  0x27   : > { %5320 = shalt.err (!%p5317_p0)
}
  0x28   : > { %s5414_s8 = smov 128   ;;  %s5415_s9 = smov 8  }
  0x29   : > { %5205 = dma.hbm_to_vmem [thread:$0]  (%p5484_p5), %s164_s19, 2048, %s166_s27, %s154_s28, %s5414_s8, %s5414_s8, %s5415_s9  }
  0x2a   : > { %s175_s11 = sand.u32 1, %s5409_s15   ;;  %s4008_s17 = sshll.u32 %s5520_s7, 9 }
  0x2b   : > { %s5001_s2 = sshll.u32 %s5409_s15, 6  ;;  %s179_s20 = scalar_lea.vmem [#allocation5], %s4008_s17 }
  0x2c   : > { %s199_s29 = sshll.u32 %s179_s20, 4  ;;  %s184_s5 = scalar_lea.hbm %s5852_s1, %s5001_s2  ;;  %s200_s29 = int_to_ptr.vmem [resolvable:$true] %s199_s29 }
  0x2d   : > { %s5206_s19 = scalar_select %p5484_p5, [#allocation0], [#allocation11] }
  0x2e   : > { %s197_s27 = sshll.u32 %s184_s5, 4  ;;  %s5416_s6 = smov 2048   ;;  %s198_s27 = int_to_ptr.hbm [resolvable:$true] %s197_s27 }
  0x2f   : > { %s189_s28 = sld [smem:[%s5206_s19]]   ;;  %s5417_s7 = smov 1024  }
  0x30   : > { %5207 = sst [smem:[#allocation10]] (%p5484_p5), %s5416_s6  ;;  %s5418_s10 = smov 16  }
  0x31   : > { %5208 = sst [smem:[#allocation10 + $0x1]] (%p5484_p5), %s5417_s7  ;;  %s5419_s8 = smov 64  }
  0x32   : > { %5209 = sst [smem:[#allocation10 + $0x2]] (%p5484_p5), %s5418_s10  ;;  %s5420_s17 = smov 4  }
  0x33   : > { %5210 = sst [smem:[#allocation10 + $0x3]] (%p5484_p5), %s5419_s8  ;;  %s176_s20 = scalar_lea.sflag [#allocation6], %s175_s11 }
  0x34   : > { %5211 = sst [smem:[#allocation10 + $0x4]] (%p5484_p5), %s5419_s8  ;;  %s5421_s30 = smov [#allocation9]  }
  0x35   : > { %s4011_s9 = sshll.u32 %s189_s28, 26  ;;  %5212 = sst [smem:[#allocation10 + $0x5]] (%p5484_p5), %s5420_s17 }
  0x36   : > { %s4012_s2 = sadd.s32 134217728, %s4011_s9 }
  0x37   : > { %5213 = dma.general (%p5484_p5), %s198_s27, 8192, %s200_s29, %s176_s20, %s5421_s30, [#allocation10], %s4012_s2, 0  }
  0x38 PF: > { %224 = sbr.rel (%p5505_p13) target bundleno = 1380 (0x564), region = 32  ;;  %s5563_s4 = sand.u32 (!%p5505_p13), 1, %s5401_s13  }
  0x39   : > { %s4014_s5 = sshll.u32 (!%p5505_p13), %s5563_s4, 7  ;;  %s227_s19 = scalar_lea.sflag (!%p5505_p13), [#allocation3], %s5563_s4 }
  0x3a   : > { %s5569_s28 = scalar_lea.vmem (!%p5505_p13), [#allocation2], %s4014_s5 }
  0x3d   : > { %5380 = dma.done.wait (%p5490_p6), %s227_s19, 2048  }
  0x3e   : > { %5382 = vsyncadd (%p5490_p6), %s227_s19, 4294965248  ;;  %s236_s22 = sand.u32 1, %s5466_s16   ;;  %s4015_s26 = sshll.u32 %s5563_s4, 9 }
  0x3f   : > { %s237_s11 = scalar_lea.sflag [#allocation6], %s236_s22  ;;  %s5577_s29 = scalar_lea.vmem [#allocation5], %s4015_s26 }
  0x40   : > { %5384 = dma.done.wait (%p5490_p6), %s237_s11, 8192  }
  0x41   : > { %5386 = vsyncadd (%p5490_p6), %s237_s11, 4294959104 }
  0x42   : > { %5388 = dma.done.wait (%p43_p4), [#allocation6], 17408  }
  0x43   : > { %5390 = vsyncadd (%p43_p4), [#allocation6], 4294949888  ;;  %v310_v0 = vlaneseq  ;;  %v5422_v2 = vmov 0.0   ;;  %v5017_v4 = vld [vmem:[#allocation7 + $0x38] sm:$0xff]  ;;  %v5016_v7 = vld [vmem:[#allocation7 + $0x30] sm:$0xff]  ;;  %vm598_vm1 = vcmask 130048  }
  0x44   : > { %v5025_v5 = vld [vmem:[#allocation7 + $0x78] sm:$0xff]  ;;  %602 = vmatpush.bf16.msra.mxu0 %v5017_v4  ;;  %v5024_v8 = vld [vmem:[#allocation7 + $0x70] sm:$0xff]  ;;  %v5026_v9 = vld [vmem:[#allocation7 + $0x80] sm:$0xff]  ;;  %s5799_s23 = scalar_lea.vmem [#allocation8], %s4014_s5  ;;  %s5202_s27 = sshll.u32 %s5466_s16, 7 }
  0x45   : > { %v311_v1 = vand.u32 127, %v310_v0  ;;  %651 = vmatpush.bf16.msra.mxu1 %v5025_v5  ;;  %707 = vmatpush.bf16.msra.mxu2 %v5026_v9  ;;  %v5015_v11 = vld [vmem:[#allocation7 + $0x28] sm:$0xff]  ;;  %v5014_v13 = vld [vmem:[#allocation7 + $0x20] sm:$0xff]  ;;  %v5013_v15 = vld [vmem:[#allocation7 + $0x18] sm:$0xff]  ;;  %s3892_s10 = scalar_lea.hbm %s5854_s3, %s5202_s27  ;;  %s3893_s8 = sshll.u32 %s5799_s23, 4  ;;  %s3894_s8 = int_to_ptr.vmem [resolvable:$true] %s3893_s8 }
  0x46   : > { %v5023_v12 = vld [vmem:[#allocation7 + $0x68] sm:$0xff]  ;;  %v5022_v14 = vld [vmem:[#allocation7 + $0x60] sm:$0xff]  ;;  %v5021_v16 = vld [vmem:[#allocation7 + $0x58] sm:$0xff]  ;;  %s3895_s9 = sshll.u32 %s3892_s10, 4  ;;  %s3881_s17 = scalar_lea.sflag [#allocation4], %s5563_s4  ;;  %s3896_s9 = int_to_ptr.hbm [resolvable:$true] %s3895_s9 }
  0x47   : > { %vm312_vm0 = vcmp.eq.s32.totalorder %v311_v1, 0  ;;  %v5012_v17 = vld [vmem:[#allocation7 + $0x10] sm:$0xff]  ;;  %v5050_v18 = vld [vmem:[#allocation7 + $0x100] sm:$0xff]  ;;  %v279_v21 = vld [vmem:[%s5569_s28 + $0x8] sm:$0xff]  ;;  %s5349_s2 = sshra.s32 %s3896_s9, 4  ;;  %s5355_s5 = scalar_lea.hbm %s5854_s3, 256  ;;  %s5350_s2 = int_to_ptr.hbm [resolvable:$true] %s5349_s2 }
  0x48   : > { %v4018_v3 = vsel %vm312_vm0, 1.0, %v5422_v2  ;;  %603 = vmatpush.bf16.msra.mxu0 %v5016_v7  ;;  %v5020_v19 = vld [vmem:[#allocation7 + $0x50] sm:$0xff]  ;;  %v278_v20 = vld [vmem:[%s5569_s28] sm:$0xff]  ;;  %v333_v23 = vpack.c.bf16 %v279_v21, %v279_v21  ;;  %v5011_v24 = vld [vmem:[#allocation7 + $0x8] sm:$0xff]  ;;  %s5351_s16 = scalar_lea.hbm %s5350_s2, 128  ;;  %p5356_p13 = scmp.lt.s32.totalorder %s5350_s2, %s5854_s3 }
  0x49   : > { %v315_v6 = vpack.c.bf16 %v4018_v3, %v4018_v3  ;;  %652 = vmatpush.bf16.msra.mxu1 %v5024_v8  ;;  %1096 = vmatpush.bf16.msrb.mxu2 %v5050_v18  ;;  %v332_v22 = vpack.c.bf16 %v278_v20, %v278_v20  ;;  %v5019_v25 = vld [vmem:[#allocation7 + $0x48] sm:$0xff]  ;;  %v5010_v28 = vld [vmem:[#allocation7] sm:$0xff]  ;;  %v5049_v33 = vld [vmem:[#allocation7 + $0xf8] sm:$0xff]  ;;  %p5352_p4 = scmp.ne.s32.totalorder %s5350_s2, %s5351_s16  ;;  %p5357_p3 = scmp.lt.s32.totalorder %s5355_s5, %s5351_s16 }
  0x4a   : > { %v381_v27 = vunpack.c.l.b16 %v333_v23  ;;  %v5018_v29 = vld [vmem:[#allocation7 + $0x40] sm:$0xff]  ;;  %v5051_v32 = vld [vmem:[#allocation7 + $0x108] sm:$0xff]  ;;  %v280_v34 = vld [vmem:[%s5569_s28 + $0x10] sm:$0xff] }
  0x4b   : > { %v5587_v10 = vperm.slane %v315_v6, 0  ;;  %v380_v26 = vunpack.c.l.b16 %v332_v22  ;;  %v5002_v31 = vld [vmem:[%s5577_s29] sm:$0xff]  ;;  %v281_v35 = vld [vmem:[%s5569_s28 + $0x18] sm:$0xff]  ;;  %v334_v36 = vpack.c.bf16 %v280_v34, %v280_v34  ;;  %v5003_v41 = vld [vmem:[%s5577_s29 + $0x8] sm:$0xff]  ;;  %p5353_p5 = pnand %p5352_p4, %p5497_p11  ;;  %p5358_p7 = por %p5357_p3, %p5356_p13 }
  0x4c   : > { %604 = vmatpush.bf16.msra.mxu0 %v5015_v11  ;;  %v335_v37 = vpack.c.bf16 %v281_v35, %v281_v35  ;;  %v5048_v42 = vld [vmem:[#allocation7 + $0xf0] sm:$0xff]  ;;  %v282_v43 = vld [vmem:[%s5569_s28 + $0x20] sm:$0xff]  ;;  %v283_v44 = vld [vmem:[%s5569_s28 + $0x28] sm:$0xff] }
  0x4d   : > { %4119 = vmatmul.msk.bf16.vlgmr.msra.gmra.mxu2 %vm598_vm1, %v5587_v10  ;;  %653 = vmatpush.bf16.msra.mxu1 %v5023_v12  ;;  %v396_v30 = vpack.c.b16 %v381_v27, %v380_v26  ;;  %v382_v38 = vunpack.c.l.b16 %v334_v36  ;;  %v336_v45 = vpack.c.bf16 %v282_v43, %v282_v43  ;;  %v337_v46 = vpack.c.bf16 %v283_v44, %v283_v44  ;;  %v5004_v50 = vld [vmem:[%s5577_s29 + $0x10] sm:$0xff]  ;;  %v5047_v51 = vld [vmem:[#allocation7 + $0xe8] sm:$0xff]  ;;  %v285_v53 = vld [vmem:[%s5569_s28 + $0x38] sm:$0xff]  ;;  %p5354_p6 = pneg %p5353_p5 }
  0x4e   : > { %1097 = vmatpush.bf16.msrb.mxu2 %v5049_v33  ;;  %v383_v39 = vunpack.c.l.b16 %v335_v37  ;;  %v284_v52 = vld [vmem:[%s5569_s28 + $0x30] sm:$0xff]  ;;  %v339_v55 = vpack.c.bf16 %v285_v53, %v285_v53  ;;  %v5005_v59 = vld [vmem:[%s5577_s29 + $0x18] sm:$0xff]  ;;  %v5046_v60 = vld [vmem:[#allocation7 + $0xe0] sm:$0xff] }
  0x4f   : > { %v384_v47 = vunpack.c.l.b16 %v336_v45  ;;  %v385_v48 = vunpack.c.l.b16 %v337_v46  ;;  %v338_v54 = vpack.c.bf16 %v284_v52, %v284_v52  ;;  %v286_v61 = vld [vmem:[%s5569_s28 + $0x40] sm:$0xff]  ;;  %v287_v62 = vld [vmem:[%s5569_s28 + $0x48] sm:$0xff]  ;;  %v5045_v5 = vld [vmem:[#allocation7 + $0xd8] sm:$0xff]  ;;  %p5359_p8 = pnand %p5358_p7, %p5354_p6 }
  0x50   : > { %605 = vmatpush.bf16.msra.mxu0 %v5014_v13  ;;  %v397_v40 = vpack.c.b16 %v383_v39, %v382_v38  ;;  %v387_v57 = vunpack.c.l.b16 %v339_v55  ;;  %v340_v63 = vpack.c.bf16 %v286_v61, %v286_v61  ;;  %v341_v0 = vpack.c.bf16 %v287_v62, %v287_v62  ;;  %v5006_v4 = vld [vmem:[%s5577_s29 + $0x20] sm:$0xff]  ;;  %v288_v6 = vld [vmem:[%s5569_s28 + $0x50] sm:$0xff]  ;;  %v289_v7 = vld [vmem:[%s5569_s28 + $0x58] sm:$0xff] }
  0x51   : > { %654 = vmatpush.bf16.msra.mxu1 %v5022_v14  ;;  %v398_v49 = vpack.c.b16 %v385_v48, %v384_v47  ;;  %v386_v56 = vunpack.c.l.b16 %v338_v54  ;;  %v342_v8 = vpack.c.bf16 %v288_v6, %v288_v6  ;;  %v343_v9 = vpack.c.bf16 %v289_v7, %v289_v7  ;;  %v5007_v14 = vld [vmem:[%s5577_s29 + $0x28] sm:$0xff]  ;;  %v5040_v22 = vld [vmem:[#allocation7 + $0xb0] sm:$0xff]  ;;  %v5027_v35 = vld [vmem:[%s5577_s29 + $0x40] sm:$0xff] }
  0x52   : > { %1098 = vmatpush.bf16.msrb.mxu2 %v5048_v42  ;;  %v388_v1 = vunpack.c.l.b16 %v340_v63  ;;  %v389_v2 = vunpack.c.l.b16 %v341_v0  ;;  %v291_v18 = vld [vmem:[%s5569_s28 + $0x68] sm:$0xff]  ;;  %v5008_v27 = vld [vmem:[%s5577_s29 + $0x30] sm:$0xff]  ;;  %v5009_v42 = vld [vmem:[%s5577_s29 + $0x38] sm:$0xff] }
  0x53   : > { %v399_v58 = vpack.c.b16 %v387_v57, %v386_v56  ;;  %v390_v11 = vunpack.c.l.b16 %v342_v8  ;;  %v391_v12 = vunpack.c.l.b16 %v343_v9  ;;  %v345_v21 = vpack.c.bf16 %v291_v18, %v291_v18  ;;  %v5036_v36 = vld [vmem:[#allocation7 + $0x90] sm:$0xff]  ;;  %v5028_v44 = vld [vmem:[%s5577_s29 + $0x48] sm:$0xff]  ;;  %v5030_v8 = vld [vmem:[%s5577_s29 + $0x58] sm:$0xff] }
  0x54   : > { %606 = vmatpush.bf16.msra.mxu0 %v5013_v15  ;;  %v400_v3 = vpack.c.b16 %v389_v2, %v388_v1  ;;  %v5042_v15 = vld [vmem:[#allocation7 + $0xc0] sm:$0xff]  ;;  %v5029_v54 = vld [vmem:[%s5577_s29 + $0x50] sm:$0xff]  ;;  %v5075_v1 = vld [vmem:[#allocation7 + $0x188] sm:$0xff] }
  0x55   : > { %655 = vmatpush.bf16.msra.mxu1 %v5021_v16  ;;  %v401_v13 = vpack.c.b16 %v391_v12, %v390_v11  ;;  %v5044_v16 = vld [vmem:[#allocation7 + $0xd0] sm:$0xff]  ;;  %1047 = vmatpush.bf16.msra.mxu3 %v5042_v15  ;;  %v5067_v12 = vld [vmem:[#allocation7 + $0x148] sm:$0xff] }
  0x56   : > { %1099 = vmatpush.bf16.msrb.mxu2 %v5047_v51  ;;  %v5076_v2 = vld [vmem:[#allocation7 + $0x190] sm:$0xff] }
  0x58   : > { %607 = vmatpush.bf16.msra.mxu0 %v5012_v17  ;;  %v290_v17 = vld [vmem:[%s5569_s28 + $0x60] sm:$0xff] }
  0x59   : > { %656 = vmatpush.bf16.msra.mxu1 %v5020_v19  ;;  %v5041_v19 = vld [vmem:[#allocation7 + $0xb8] sm:$0xff]  ;;  %v344_v20 = vpack.c.bf16 %v290_v17, %v290_v17 }
  0x5a   : > { %1100 = vmatpush.bf16.msrb.mxu2 %v5046_v60  ;;  %1048 = vmatpush.bf16.msra.mxu3 %v5041_v19 }
  0x5b   : > { %v392_v23 = vunpack.c.l.b16 %v344_v20 }
  0x5c   : > { %608 = vmatpush.bf16.msra.mxu0 %v5011_v24  ;;  %v393_v24 = vunpack.c.l.b16 %v345_v21  ;;  %v5074_v21 = vld [vmem:[#allocation7 + $0x180] sm:$0xff] }
  0x5d   : > { %4120 = vmatmul.msk.bf16.gmra.mxu2 %vm598_vm1, %v5587_v10  ;;  %657 = vmatpush.bf16.msra.mxu1 %v5019_v25  ;;  %v5039_v25 = vld [vmem:[#allocation7 + $0xa8] sm:$0xff] }
  0x5e   : > { %1101 = vmatpush.bf16.msrb.mxu2 %v5045_v5  ;;  %1049 = vmatpush.bf16.msra.mxu3 %v5040_v22  ;;  %v402_v26 = vpack.c.b16 %v393_v24, %v392_v23 }
  0x60   : > { %609 = vmatpush.bf16.msra.mxu0 %v5010_v28  ;;  %v5038_v28 = vld [vmem:[#allocation7 + $0xa0] sm:$0xff] }
  0x61   : > { %658 = vmatpush.bf16.msra.mxu1 %v5018_v29  ;;  %v292_v29 = vld [vmem:[%s5569_s28 + $0x70] sm:$0xff] }
  0x62   : > { %1102 = vmatpush.bf16.msrb.mxu2 %v5044_v16  ;;  %1050 = vmatpush.bf16.msra.mxu3 %v5039_v25  ;;  %v346_v33 = vpack.c.bf16 %v292_v29, %v292_v29 }
  0x63   : > { %610 = vmatmul.bf16.vlgmr.msra.gmra.mxu0 %v396_v30  ;;  %v293_v30 = vld [vmem:[%s5569_s28 + $0x78] sm:$0xff] }
  0x64   : > { %659 = vmatmul.bf16.vlgmr.msra.gmra.mxu1 %v5002_v31  ;;  %1152 = vmatpush.bf16.msrb.mxu0 %v5051_v32  ;;  %v5043_v31 = vld [vmem:[#allocation7 + $0xc8] sm:$0xff]  ;;  %v5037_v32 = vld [vmem:[#allocation7 + $0x98] sm:$0xff]  ;;  %v347_v34 = vpack.c.bf16 %v293_v30, %v293_v30  ;;  %v394_v37 = vunpack.c.l.b16 %v346_v33  ;;  %v5066_v30 = vld [vmem:[#allocation7 + $0x140] sm:$0xff] }
  0x65   : > { %1492 = vmatpush.bf16.msrb.mxu1 %v5067_v12  ;;  %v5071_v12 = vld [vmem:[#allocation7 + $0x168] sm:$0xff] }
  0x66   : > { %1051 = vmatpush.bf16.msra.mxu3 %v5038_v28  ;;  %1103 = vmatpush.bf16.msrb.mxu2 %v5043_v31  ;;  %v395_v38 = vunpack.c.l.b16 %v347_v34 }
  0x69   : > { %1493 = vmatpush.bf16.msrb.mxu1 %v5066_v30 }
  0x6a   : > { %1052 = vmatpush.bf16.msra.mxu3 %v5037_v32  ;;  %1597 = vmatpush.bf16.msra.mxu2 %v5076_v2  ;;  %v5064_v2 = vld [vmem:[#allocation7 + $0x130] sm:$0xff] }
  0x6d   : > { %4121 = vmatmul.msk.bf16.gmra.mxu2 %vm598_vm1, %v5587_v10 }
  0x6e   : > { %1053 = vmatpush.bf16.msra.mxu3 %v5036_v36 }
  0x73   : > { %615 = vmatmul.bf16.gmra.mxu0 %v397_v40  ;;  %v5035_v40 = vld [vmem:[#allocation7 + $0x88] sm:$0xff] }
  0x74   : > { %664 = vmatmul.bf16.gmra.mxu1 %v5003_v41  ;;  %v403_v41 = vpack.c.b16 %v395_v38, %v394_v37  ;;  %1054 = vmatpush.bf16.msra.mxu3 %v5035_v40 }
  0x78   : > { %1541 = vmatpush.bf16.msrb.mxu3 %v5075_v1 }
  0x7c   : > { %1542 = vmatpush.bf16.msrb.mxu3 %v5074_v21  ;;  %v5063_v21 = vld [vmem:[#allocation7 + $0x128] sm:$0xff] }
  0x7d   : > { %4122 = vmatmul.msk.bf16.gmra.mxu2 %vm598_vm1, %v5587_v10 }
  0x83   : > { %620 = vmatmul.bf16.gmra.mxu0 %v398_v49 }
  0x84   : > { %669 = vmatmul.bf16.gmra.mxu1 %v5004_v50 }
  0x8d   : > { %4123 = vmatmul.msk.bf16.gmra.mxu2 %vm598_vm1, %v5587_v10 }
  0x93   : > { %625 = vmatmul.bf16.gmra.mxu0 %v399_v58 }
  0x94   : > { %674 = vmatmul.bf16.gmra.mxu1 %v5005_v59 }
  0x9d   : > { %4124 = vmatmul.msk.bf16.gmra.mxu2 %vm598_vm1, %v5587_v10 }
  0xa3   : > { %630 = vmatmul.bf16.gmra.mxu0 %v400_v3 }
  0xa4   : > { %679 = vmatmul.bf16.gmra.mxu1 %v5006_v4 }
  0xad   : > { %4125 = vmatmul.msk.bf16.gmra.mxu2 %vm598_vm1, %v5587_v10 }
  0xb3   : > { %635 = vmatmul.bf16.gmra.mxu0 %v401_v13 }
  0xb4   : > { %684 = vmatmul.bf16.gmra.mxu1 %v5007_v14 }
  0xbd   : > { %4126 = vmatmul.msk.bf16.gmra.mxu2 %vm598_vm1, %v5587_v10 }
  0xc3   : > { %640 = vmatmul.bf16.gmra.mxu0 %v402_v26 }
  0xc4   : > { %689 = vmatmul.bf16.gmra.mxu1 %v5008_v27  ;;  %v5031_v27 = vld [vmem:[%s5577_s29 + $0x60] sm:$0xff] }
  0xcd   : > { %1104 = vmatmul.bf16.vlgmr.msrb.gmra.mxu2 %v5027_v35 }
  0xd0   : > { %v709_v39 = vpop.f32.mrf.mxu2 }
  0xd3   : > { %645 = vmatmul.bf16.gmra.mxu0 %v403_v41 }
  0xd4   : > { %694 = vmatmul.bf16.gmra.mxu1 %v5009_v42 }
  0xd8   : > { %v711_v43 = vpop.f32.mrf.mxu2 }
  0xdd   : > { %1109 = vmatmul.bf16.gmra.mxu2 %v5028_v44 }
  0xe0   : > { %v714_v45 = vpop.f32.mrf.mxu2  ;;  %v611_v46 = vpop.f32.mrf.mxu0 }
  0xe1   : > { %v660_v47 = vpop.f32.mrf.mxu1 }
  0xe2   : > { %v661_v48 = vadd.f32 %v660_v47, %v611_v46 }
  0xe3   : > { %4243 = vmatmul.msk.bf16.vlgmr.msrb.gmra.mxu0 %vm598_vm1, %v5587_v10 }
  0xe4   : > { %v710_v50 = vadd.f32 %v709_v39, %v661_v48  ;;  %v5073_v39 = vld [vmem:[#allocation7 + $0x178] sm:$0xff] }
  0xe5   : > { %1543 = vmatpush.bf16.msrb.mxu3 %v5073_v39  ;;  %v5065_v48 = vld [vmem:[#allocation7 + $0x138] sm:$0xff] }
  0xe6   : > { %v781_v56 = vpack.c.bf16 %v710_v50, %v710_v50  ;;  %1494 = vmatpush.bf16.msrb.mxu1 %v5065_v48 }
  0xe8   : > { %v716_v49 = vpop.f32.mrf.mxu2  ;;  %v613_v51 = vpop.f32.mrf.mxu0  ;;  %v830_v59 = vunpack.c.l.b16 %v781_v56 }
  0xe9   : > { %v662_v52 = vpop.f32.mrf.mxu1 }
  0xea   : > { %v663_v53 = vadd.f32 %v662_v52, %v613_v51  ;;  %1495 = vmatpush.bf16.msrb.mxu1 %v5064_v2  ;;  %v5052_v2 = vld [vmem:[%s5577_s29 + $0x80] sm:$0xff] }
  0xec   : > { %v712_v55 = vadd.f32 %v711_v43, %v663_v53 }
  0xed   : > { %1114 = vmatmul.bf16.gmra.mxu2 %v5029_v54 }
  0xee   : > { %v782_v58 = vpack.c.bf16 %v712_v55, %v712_v55  ;;  %1496 = vmatpush.bf16.msrb.mxu1 %v5063_v21 }
  0xf0   : > { %v719_v57 = vpop.f32.mrf.mxu2  ;;  %v831_v60 = vunpack.c.l.b16 %v782_v58  ;;  %v616_v61 = vpop.f32.mrf.mxu0 }
  0xf1   : > { %v665_v62 = vpop.f32.mrf.mxu1 }
  0xf2   : > { %v846_v63 = vpack.c.b16 %v831_v60, %v830_v59  ;;  %v666_v0 = vadd.f32 %v665_v62, %v616_v61 }
  0xf3   : > { %4244 = vmatmul.msk.bf16.gmra.mxu0 %vm598_vm1, %v5587_v10 }
  0xf4   : > { %1055 = vmatmul.bf16.vlgmr.msra.gmra.mxu3 %v846_v63  ;;  %v715_v4 = vadd.f32 %v714_v45, %v666_v0  ;;  %v5032_v45 = vld [vmem:[%s5577_s29 + $0x68] sm:$0xff]  ;;  %v5033_v63 = vld [vmem:[%s5577_s29 + $0x70] sm:$0xff] }
  0xf6   : > { %v783_v11 = vpack.c.bf16 %v715_v4, %v715_v4 }
  0xf8   : > { %v721_v3 = vpop.f32.mrf.mxu2  ;;  %v618_v5 = vpop.f32.mrf.mxu0  ;;  %v832_v15 = vunpack.c.l.b16 %v783_v11 }
  0xf9   : > { %v667_v6 = vpop.f32.mrf.mxu1 }
  0xfa   : > { %v668_v7 = vadd.f32 %v667_v6, %v618_v5 }
  0xfc   : > { %v717_v9 = vadd.f32 %v716_v49, %v668_v7 }
  0xfd   : > { %1119 = vmatmul.bf16.gmra.mxu2 %v5030_v8 }
  0xfe   : > { %v784_v14 = vpack.c.bf16 %v717_v9, %v717_v9 }
 0x100   : > { %v724_v13 = vpop.f32.mrf.mxu2  ;;  %v833_v16 = vunpack.c.l.b16 %v784_v14  ;;  %v621_v17 = vpop.f32.mrf.mxu0 }
 0x101   : > { %v670_v18 = vpop.f32.mrf.mxu1 }
 0x102   : > { %v847_v19 = vpack.c.b16 %v833_v16, %v832_v15  ;;  %v671_v20 = vadd.f32 %v670_v18, %v621_v17  ;;  %v5034_v18 = vld [vmem:[%s5577_s29 + $0x78] sm:$0xff] }
 0x103   : > { %4245 = vmatmul.msk.bf16.gmra.mxu0 %vm598_vm1, %v5587_v10 }
 0x104   : > { %1060 = vmatmul.bf16.gmra.mxu3 %v847_v19  ;;  %v720_v23 = vadd.f32 %v719_v57, %v671_v20  ;;  %v5072_v57 = vld [vmem:[#allocation7 + $0x170] sm:$0xff] }
 0x105   : > { %1544 = vmatpush.bf16.msrb.mxu3 %v5072_v57 }
 0x106   : > { %v785_v29 = vpack.c.bf16 %v720_v23, %v720_v23 }
 0x108   : > { %v726_v22 = vpop.f32.mrf.mxu2  ;;  %v623_v24 = vpop.f32.mrf.mxu0  ;;  %v834_v33 = vunpack.c.l.b16 %v785_v29 }
 0x109   : > { %v672_v25 = vpop.f32.mrf.mxu1  ;;  %1545 = vmatpush.bf16.msrb.mxu3 %v5071_v12 }
 0x10a   : > { %v673_v26 = vadd.f32 %v672_v25, %v623_v24  ;;  %v5062_v25 = vld [vmem:[#allocation7 + $0x120] sm:$0xff] }
 0x10b   : > { %1497 = vmatpush.bf16.msrb.mxu1 %v5062_v25  ;;  %v5092_v25 = vld [vmem:[#allocation7 + $0x1d0] sm:$0xff] }
 0x10c   : > { %v722_v28 = vadd.f32 %v721_v3, %v673_v26  ;;  %1937 = vmatpush.bf16.msra.mxu0 %v5092_v25 }
 0x10d   : > { %1124 = vmatmul.bf16.gmra.mxu2 %v5031_v27 }
 0x10e   : > { %v786_v32 = vpack.c.bf16 %v722_v28, %v722_v28 }
 0x110   : > { %v729_v31 = vpop.f32.mrf.mxu2  ;;  %v835_v34 = vunpack.c.l.b16 %v786_v32  ;;  %v626_v35 = vpop.f32.mrf.mxu0  ;;  %v5069_v32 = vld [vmem:[#allocation7 + $0x158] sm:$0xff] }
 0x111   : > { %v675_v36 = vpop.f32.mrf.mxu1 }
 0x112   : > { %v848_v37 = vpack.c.b16 %v835_v34, %v834_v33  ;;  %v676_v38 = vadd.f32 %v675_v36, %v626_v35  ;;  %v5061_v33 = vld [vmem:[#allocation7 + $0x118] sm:$0xff] }
 0x113   : > { %4246 = vmatmul.msk.bf16.gmra.mxu0 %vm598_vm1, %v5587_v10  ;;  %1498 = vmatpush.bf16.msrb.mxu1 %v5061_v33 }
 0x114   : > { %1065 = vmatmul.bf16.gmra.mxu3 %v848_v37  ;;  %v725_v41 = vadd.f32 %v724_v13, %v676_v38 }
 0x116   : > { %v787_v47 = vpack.c.bf16 %v725_v41, %v725_v41 }
 0x118   : > { %v731_v40 = vpop.f32.mrf.mxu2  ;;  %v628_v42 = vpop.f32.mrf.mxu0  ;;  %v836_v51 = vunpack.c.l.b16 %v787_v47 }
 0x119   : > { %v677_v43 = vpop.f32.mrf.mxu1 }
 0x11a   : > { %v678_v44 = vadd.f32 %v677_v43, %v628_v42 }
 0x11c   : > { %v727_v46 = vadd.f32 %v726_v22, %v678_v44  ;;  %v5070_v22 = vld [vmem:[#allocation7 + $0x160] sm:$0xff] }
 0x11d   : > { %1129 = vmatmul.bf16.gmra.mxu2 %v5032_v45  ;;  %1546 = vmatpush.bf16.msrb.mxu3 %v5070_v22 }
 0x11e   : > { %v788_v50 = vpack.c.bf16 %v727_v46, %v727_v46 }
 0x120   : > { %v734_v49 = vpop.f32.mrf.mxu2  ;;  %v837_v52 = vunpack.c.l.b16 %v788_v50  ;;  %v631_v53 = vpop.f32.mrf.mxu0  ;;  %v5068_v50 = vld [vmem:[#allocation7 + $0x150] sm:$0xff] }
 0x121   : > { %v680_v54 = vpop.f32.mrf.mxu1  ;;  %1547 = vmatpush.bf16.msrb.mxu3 %v5069_v32 }
 0x122   : > { %v849_v55 = vpack.c.b16 %v837_v52, %v836_v51  ;;  %v681_v56 = vadd.f32 %v680_v54, %v631_v53 }
 0x123   : > { %4247 = vmatmul.msk.bf16.gmra.mxu0 %vm598_vm1, %v5587_v10 }
 0x124   : > { %1070 = vmatmul.bf16.gmra.mxu3 %v849_v55  ;;  %v730_v59 = vadd.f32 %v729_v31, %v681_v56 }
 0x125   : > { %1548 = vmatpush.bf16.msrb.mxu3 %v5068_v50 }
 0x126   : > { %v789_v1 = vpack.c.bf16 %v730_v59, %v730_v59 }
 0x128   : > { %v736_v58 = vpop.f32.mrf.mxu2  ;;  %v633_v60 = vpop.f32.mrf.mxu0  ;;  %v838_v5 = vunpack.c.l.b16 %v789_v1 }
 0x129   : > { %v682_v61 = vpop.f32.mrf.mxu1 }
 0x12a   : > { %v683_v62 = vadd.f32 %v682_v61, %v633_v60 }
 0x12c   : > { %v732_v0 = vadd.f32 %v731_v40, %v683_v62 }
 0x12d   : > { %1134 = vmatmul.bf16.gmra.mxu2 %v5033_v63  ;;  %v5060_v63 = vld [vmem:[#allocation7 + $0x110] sm:$0xff] }
 0x12e   : > { %v790_v4 = vpack.c.bf16 %v732_v0, %v732_v0  ;;  %1499 = vmatpush.bf16.msrb.mxu1 %v5060_v63 }
 0x130   : > { %v739_v3 = vpop.f32.mrf.mxu2  ;;  %v839_v6 = vunpack.c.l.b16 %v790_v4  ;;  %v636_v7 = vpop.f32.mrf.mxu0 }
 0x131   : > { %v685_v8 = vpop.f32.mrf.mxu1 }
 0x132   : > { %v850_v9 = vpack.c.b16 %v839_v6, %v838_v5  ;;  %v686_v11 = vadd.f32 %v685_v8, %v636_v7 }
 0x133   : > { %4248 = vmatmul.msk.bf16.gmra.mxu0 %vm598_vm1, %v5587_v10 }
 0x134   : > { %1075 = vmatmul.bf16.gmra.mxu3 %v850_v9  ;;  %v735_v14 = vadd.f32 %v734_v49, %v686_v11 }
 0x136   : > { %v791_v20 = vpack.c.bf16 %v735_v14, %v735_v14 }
 0x138   : > { %v741_v13 = vpop.f32.mrf.mxu2  ;;  %v638_v15 = vpop.f32.mrf.mxu0  ;;  %v840_v26 = vunpack.c.l.b16 %v791_v20 }
 0x139   : > { %v687_v16 = vpop.f32.mrf.mxu1 }
 0x13a   : > { %v688_v17 = vadd.f32 %v687_v16, %v638_v15  ;;  %v5101_v16 = vld [vmem:[#allocation7 + $0x218] sm:$0xff] }
 0x13b   : > { %2042 = vmatpush.bf16.msra.mxu3 %v5101_v16 }
 0x13c   : > { %v737_v19 = vadd.f32 %v736_v58, %v688_v17 }
 0x13d   : > { %1139 = vmatmul.bf16.gmra.mxu2 %v5034_v18 }
 0x13e   : > { %v792_v24 = vpack.c.bf16 %v737_v19, %v737_v19 }
 0x140   : > { %v744_v23 = vpop.f32.mrf.mxu2  ;;  %v841_v27 = vunpack.c.l.b16 %v792_v24  ;;  %v641_v28 = vpop.f32.mrf.mxu0 }
 0x141   : > { %v690_v29 = vpop.f32.mrf.mxu1 }
 0x142   : > { %v851_v30 = vpack.c.b16 %v841_v27, %v840_v26  ;;  %v691_v31 = vadd.f32 %v690_v29, %v641_v28  ;;  %v5100_v26 = vld [vmem:[#allocation7 + $0x210] sm:$0xff] }
 0x143   : > { %4249 = vmatmul.msk.bf16.gmra.mxu0 %vm598_vm1, %v5587_v10  ;;  %1986 = vmatpush.bf16.msra.mxu1 %v5100_v26 }
 0x144   : > { %1080 = vmatmul.bf16.gmra.mxu3 %v851_v30  ;;  %v740_v35 = vadd.f32 %v739_v3, %v691_v31  ;;  %v5054_v31 = vld [vmem:[%s5577_s29 + $0x90] sm:$0xff] }
 0x146   : > { %v793_v40 = vpack.c.bf16 %v740_v35, %v740_v35 }
 0x148   : > { %v746_v34 = vpop.f32.mrf.mxu2  ;;  %v643_v36 = vpop.f32.mrf.mxu0  ;;  %v842_v43 = vunpack.c.l.b16 %v793_v40 }
 0x149   : > { %v692_v37 = vpop.f32.mrf.mxu1 }
 0x14a   : > { %v693_v38 = vadd.f32 %v692_v37, %v643_v36 }
 0x14c   : > { %v742_v39 = vadd.f32 %v741_v13, %v693_v38  ;;  %v5053_v13 = vld [vmem:[%s5577_s29 + $0x88] sm:$0xff] }
 0x14d   : > { %4367 = vmatmul.msk.bf16.vlgmr.msra.gmra.mxu2 %vm598_vm1, %v5587_v10 }
 0x14e   : > { %v794_v41 = vpack.c.bf16 %v742_v39, %v742_v39 }
 0x150   : > { %v1105_v42 = vpop.f32.mrf.mxu2  ;;  %v843_v44 = vunpack.c.l.b16 %v794_v41  ;;  %v646_v45 = vpop.f32.mrf.mxu0 }
 0x151   : > { %v695_v46 = vpop.f32.mrf.mxu1 }
 0x152   : > { %v852_v47 = vpack.c.b16 %v843_v44, %v842_v43  ;;  %v696_v48 = vadd.f32 %v695_v46, %v646_v45  ;;  %v5099_v43 = vld [vmem:[#allocation7 + $0x208] sm:$0xff] }
 0x153   : > { %4250 = vmatmul.msk.bf16.gmra.mxu0 %vm598_vm1, %v5587_v10  ;;  %1987 = vmatpush.bf16.msra.mxu1 %v5099_v43 }
 0x154   : > { %1085 = vmatmul.bf16.gmra.mxu3 %v852_v47  ;;  %v745_v51 = vadd.f32 %v744_v23, %v696_v48  ;;  %v5055_v48 = vld [vmem:[%s5577_s29 + $0x98] sm:$0xff] }
 0x156   : > { %v795_v56 = vpack.c.bf16 %v745_v51, %v745_v51 }
 0x158   : > { %v1107_v49 = vpop.f32.mrf.mxu2  ;;  %v648_v52 = vpop.f32.mrf.mxu0  ;;  %v844_v58 = vunpack.c.l.b16 %v795_v56 }
 0x159   : > { %v697_v53 = vpop.f32.mrf.mxu1 }
 0x15a   : > { %v698_v54 = vadd.f32 %v697_v53, %v648_v52 }
 0x15c   : > { %v747_v55 = vadd.f32 %v746_v34, %v698_v54 }
 0x15d   : > { %4368 = vmatmul.msk.bf16.gmra.mxu2 %vm598_vm1, %v5587_v10 }
 0x15e   : > { %v796_v57 = vpack.c.bf16 %v747_v55, %v747_v55 }
 0x160   : > { %v845_v59 = vunpack.c.l.b16 %v796_v57  ;;  %v1110_v60 = vpop.f32.mrf.mxu2  ;;  %v1154_v61 = vpop.f32.mrf.mxu0 }
 0x162   : > { %v853_v62 = vpack.c.b16 %v845_v59, %v844_v58  ;;  %v5090_v59 = vld [vmem:[#allocation7 + $0x1c0] sm:$0xff] }
 0x164   : > { %1090 = vmatmul.bf16.gmra.mxu3 %v853_v62 }
 0x168   : > { %v1156_v0 = vpop.f32.mrf.mxu0  ;;  %v1112_v1 = vpop.f32.mrf.mxu2 }
 0x16d   : > { %4369 = vmatmul.msk.bf16.gmra.mxu2 %vm598_vm1, %v5587_v10 }
 0x170   : > { %v1159_v3 = vpop.f32.mrf.mxu0  ;;  %v1115_v4 = vpop.f32.mrf.mxu2 }
 0x174   : > { %1549 = vmatmul.bf16.vlgmr.msrb.gmra.mxu3 %v5052_v2  ;;  %v5056_v2 = vld [vmem:[%s5577_s29 + $0xa0] sm:$0xff] }
 0x177   : > { %v1056_v5 = vpop.f32.mrf.mxu3 }
 0x178   : > { %v1161_v6 = vpop.f32.mrf.mxu0  ;;  %v1106_v7 = vadd.f32 %v1105_v42, %v1056_v5  ;;  %v1117_v9 = vpop.f32.mrf.mxu2  ;;  %v5091_v42 = vld [vmem:[#allocation7 + $0x1c8] sm:$0xff] }
 0x179   : > { %1938 = vmatpush.bf16.msra.mxu0 %v5091_v42 }
 0x17a   : > { %v1155_v8 = vadd.f32 %v1154_v61, %v1106_v7 }
 0x17c   : > { %v1226_v15 = vpack.c.bf16 %v1155_v8, %v1155_v8 }
 0x17d   : > { %4370 = vmatmul.msk.bf16.gmra.mxu2 %vm598_vm1, %v5587_v10  ;;  %1939 = vmatpush.bf16.msra.mxu0 %v5090_v59 }
 0x17e   : > { %v1275_v19 = vunpack.c.l.b16 %v1226_v15  ;;  %v5097_v15 = vld [vmem:[#allocation7 + $0x1f8] sm:$0xff] }
 0x17f   : > { %v1058_v11 = vpop.f32.mrf.mxu3 }
 0x180   : > { %v1108_v12 = vadd.f32 %v1107_v49, %v1058_v11  ;;  %v1164_v17 = vpop.f32.mrf.mxu0  ;;  %v1120_v23 = vpop.f32.mrf.mxu2 }
 0x182   : > { %v1157_v14 = vadd.f32 %v1156_v0, %v1108_v12 }
 0x184   : > { %v1227_v18 = vpack.c.bf16 %v1157_v14, %v1157_v14  ;;  %1554 = vmatmul.bf16.gmra.mxu3 %v5053_v13  ;;  %v5089_v14 = vld [vmem:[#allocation7 + $0x1b8] sm:$0xff] }
 0x185   : > { %1940 = vmatpush.bf16.msra.mxu0 %v5089_v14 }
 0x186   : > { %v1276_v20 = vunpack.c.l.b16 %v1227_v18 }
 0x187   : > { %v1061_v21 = vpop.f32.mrf.mxu3 }
 0x188   : > { %v1291_v22 = vpack.c.b16 %v1276_v20, %v1275_v19  ;;  %v1111_v24 = vadd.f32 %v1110_v60, %v1061_v21  ;;  %v1166_v27 = vpop.f32.mrf.mxu0  ;;  %v1122_v34 = vpop.f32.mrf.mxu2  ;;  %v5098_v60 = vld [vmem:[#allocation7 + $0x200] sm:$0xff]  ;;  %v5057_v20 = vld [vmem:[%s5577_s29 + $0xa8] sm:$0xff] }
 0x189   : > { %1988 = vmatpush.bf16.msra.mxu1 %v5098_v60 }
 0x18a   : > { %1500 = vmatmul.bf16.vlgmr.msrb.gmra.mxu1 %v1291_v22  ;;  %v1160_v28 = vadd.f32 %v1159_v3, %v1111_v24 }
 0x18c   : > { %v1228_v33 = vpack.c.bf16 %v1160_v28, %v1160_v28 }
 0x18d   : > { %4371 = vmatmul.msk.bf16.gmra.mxu2 %vm598_vm1, %v5587_v10  ;;  %1989 = vmatpush.bf16.msra.mxu1 %v5097_v15 }
 0x18e   : > { %v1277_v36 = vunpack.c.l.b16 %v1228_v33 }
 0x18f   : > { %v1063_v29 = vpop.f32.mrf.mxu3 }
 0x190   : > { %v1113_v30 = vadd.f32 %v1112_v1, %v1063_v29  ;;  %v1169_v39 = vpop.f32.mrf.mxu0  ;;  %v1125_v44 = vpop.f32.mrf.mxu2 }
 0x192   : > { %v1162_v32 = vadd.f32 %v1161_v6, %v1113_v30 }
 0x194   : > { %v1229_v35 = vpack.c.bf16 %v1162_v32, %v1162_v32  ;;  %1559 = vmatmul.bf16.gmra.mxu3 %v5054_v31  ;;  %v5088_v31 = vld [vmem:[#allocation7 + $0x1b0] sm:$0xff] }
 0x195   : > { %v5096_v32 = vld [vmem:[#allocation7 + $0x1f0] sm:$0xff]  ;;  %1941 = vmatpush.bf16.msra.mxu0 %v5088_v31 }
 0x196   : > { %v1278_v37 = vunpack.c.l.b16 %v1229_v35  ;;  %1990 = vmatpush.bf16.msra.mxu1 %v5096_v32 }
 0x197   : > { %v1066_v38 = vpop.f32.mrf.mxu3 }
 0x198   : > { %v1292_v40 = vpack.c.b16 %v1278_v37, %v1277_v36  ;;  %v1116_v41 = vadd.f32 %v1115_v4, %v1066_v38  ;;  %v1171_v49 = vpop.f32.mrf.mxu0  ;;  %v1127_v55 = vpop.f32.mrf.mxu2  ;;  %v5058_v37 = vld [vmem:[%s5577_s29 + $0xb0] sm:$0xff] }
 0x19a   : > { %1505 = vmatmul.bf16.gmra.mxu1 %v1292_v40  ;;  %v1165_v45 = vadd.f32 %v1164_v17, %v1116_v41  ;;  %v5087_v40 = vld [vmem:[#allocation7 + $0x1a8] sm:$0xff] }
 0x19b   : > { %v5095_v41 = vld [vmem:[#allocation7 + $0x1e8] sm:$0xff]  ;;  %1942 = vmatpush.bf16.msra.mxu0 %v5087_v40 }
 0x19c   : > { %v1230_v51 = vpack.c.bf16 %v1165_v45, %v1165_v45  ;;  %1991 = vmatpush.bf16.msra.mxu1 %v5095_v41  ;;  %v5117_v41 = vld [vmem:[#allocation7 + $0x258] sm:$0xff] }
 0x19d   : > { %4372 = vmatmul.msk.bf16.gmra.mxu2 %vm598_vm1, %v5587_v10 }
 0x19e   : > { %v1279_v53 = vunpack.c.l.b16 %v1230_v51  ;;  %v5094_v51 = vld [vmem:[#allocation7 + $0x1e0] sm:$0xff]  ;;  %2382 = vmatpush.bf16.msrb.mxu2 %v5117_v41 }
 0x19f   : > { %v1068_v46 = vpop.f32.mrf.mxu3 }
 0x1a0   : > { %v1118_v47 = vadd.f32 %v1117_v9, %v1068_v46  ;;  %v1174_v61 = vpop.f32.mrf.mxu0  ;;  %v1130_v1 = vpop.f32.mrf.mxu2  ;;  %1992 = vmatpush.bf16.msra.mxu1 %v5094_v51 }
 0x1a2   : > { %v1167_v50 = vadd.f32 %v1166_v27, %v1118_v47 }
 0x1a4   : > { %v1231_v52 = vpack.c.bf16 %v1167_v50, %v1167_v50  ;;  %1564 = vmatmul.bf16.gmra.mxu3 %v5055_v48  ;;  %v5086_v50 = vld [vmem:[#allocation7 + $0x1a0] sm:$0xff] }
 0x1a5   : > { %1943 = vmatpush.bf16.msra.mxu0 %v5086_v50  ;;  %v5126_v50 = vld [vmem:[#allocation7 + $0x2a0] sm:$0xff] }
 0x1a6   : > { %v1280_v54 = vunpack.c.l.b16 %v1231_v52 }
 0x1a7   : > { %v1071_v56 = vpop.f32.mrf.mxu3 }
 0x1a8   : > { %v1293_v57 = vpack.c.b16 %v1280_v54, %v1279_v53  ;;  %v1121_v58 = vadd.f32 %v1120_v23, %v1071_v56  ;;  %v1176_v6 = vpop.f32.mrf.mxu0  ;;  %v1132_v13 = vpop.f32.mrf.mxu2  ;;  %v5059_v56 = vld [vmem:[%s5577_s29 + $0xb8] sm:$0xff] }
 0x1aa   : > { %1510 = vmatmul.bf16.gmra.mxu1 %v1293_v57  ;;  %v1170_v62 = vadd.f32 %v1169_v39, %v1121_v58 }
 0x1ac   : > { %v1232_v4 = vpack.c.bf16 %v1170_v62, %v1170_v62 }
 0x1ad   : > { %4373 = vmatmul.msk.bf16.gmra.mxu2 %vm598_vm1, %v5587_v10 }
 0x1ae   : > { %v1281_v7 = vunpack.c.l.b16 %v1232_v4  ;;  %v5093_v4 = vld [vmem:[#allocation7 + $0x1d8] sm:$0xff] }
 0x1af   : > { %v1073_v63 = vpop.f32.mrf.mxu3  ;;  %1993 = vmatpush.bf16.msra.mxu1 %v5093_v4  ;;  %v5124_v4 = vld [vmem:[#allocation7 + $0x290] sm:$0xff] }
 0x1b0   : > { %v1123_v0 = vadd.f32 %v1122_v34, %v1073_v63  ;;  %v1179_v18 = vpop.f32.mrf.mxu0  ;;  %v1135_v23 = vpop.f32.mrf.mxu2 }
 0x1b2   : > { %v1172_v3 = vadd.f32 %v1171_v49, %v1123_v0 }
 0x1b3   : > { %2487 = vmatpush.bf16.msrb.mxu1 %v5126_v50  ;;  %v5113_v50 = vld [vmem:[#allocation7 + $0x238] sm:$0xff] }
 0x1b4   : > { %v1233_v5 = vpack.c.bf16 %v1172_v3, %v1172_v3  ;;  %1569 = vmatmul.bf16.gmra.mxu3 %v5056_v2 }
 0x1b6   : > { %v1282_v8 = vunpack.c.l.b16 %v1233_v5 }
 0x1b7   : > { %v1076_v9 = vpop.f32.mrf.mxu3 }
 0x1b8   : > { %v1294_v11 = vpack.c.b16 %v1282_v8, %v1281_v7  ;;  %v1126_v12 = vadd.f32 %v1125_v44, %v1076_v9  ;;  %v1181_v29 = vpop.f32.mrf.mxu0  ;;  %v1137_v34 = vpop.f32.mrf.mxu2 }
 0x1ba   : > { %1515 = vmatmul.bf16.gmra.mxu1 %v1294_v11  ;;  %v1175_v16 = vadd.f32 %v1174_v61, %v1126_v12  ;;  %v5085_v12 = vld [vmem:[#allocation7 + $0x198] sm:$0xff] }
 0x1bb   : > { %1944 = vmatpush.bf16.msra.mxu0 %v5085_v12 }
 0x1bc   : > { %v1234_v22 = vpack.c.bf16 %v1175_v16, %v1175_v16 }
 0x1bd   : > { %4374 = vmatmul.msk.bf16.gmra.mxu2 %vm598_vm1, %v5587_v10 }
 0x1be   : > { %v1283_v25 = vunpack.c.l.b16 %v1234_v22 }
 0x1bf   : > { %v1078_v17 = vpop.f32.mrf.mxu3 }
 0x1c0   : > { %v1128_v19 = vadd.f32 %v1127_v55, %v1078_v17  ;;  %v1184_v42 = vpop.f32.mrf.mxu0  ;;  %v1140_v47 = vpop.f32.mrf.mxu2 }
 0x1c2   : > { %v1177_v21 = vadd.f32 %v1176_v6, %v1128_v19 }
 0x1c4   : > { %v1235_v24 = vpack.c.bf16 %v1177_v21, %v1177_v21  ;;  %1574 = vmatmul.bf16.gmra.mxu3 %v5057_v20  ;;  %v5077_v21 = vld [vmem:[%s5577_s29 + $0xc0] sm:$0xff] }
 0x1c6   : > { %v1284_v26 = vunpack.c.l.b16 %v1235_v24 }
 0x1c7   : > { %v1081_v27 = vpop.f32.mrf.mxu3 }
 0x1c8   : > { %v1295_v28 = vpack.c.b16 %v1284_v26, %v1283_v25  ;;  %v1131_v30 = vadd.f32 %v1130_v1, %v1081_v27  ;;  %v1186_v52 = vpop.f32.mrf.mxu0  ;;  %v1142_v58 = vpop.f32.mrf.mxu2 }
 0x1ca   : > { %1520 = vmatmul.bf16.gmra.mxu1 %v1295_v28  ;;  %v1180_v33 = vadd.f32 %v1179_v18, %v1131_v30 }
 0x1cc   : > { %v1236_v39 = vpack.c.bf16 %v1180_v33, %v1180_v33 }
 0x1ce   : > { %v1285_v44 = vunpack.c.l.b16 %v1236_v39 }
 0x1cf   : > { %v1083_v35 = vpop.f32.mrf.mxu3 }
 0x1d0   : > { %v1133_v36 = vadd.f32 %v1132_v13, %v1083_v35  ;;  %v1189_v63 = vpop.f32.mrf.mxu0  ;;  %v1599_v3 = vpop.f32.mrf.mxu2 }
 0x1d2   : > { %v1182_v38 = vadd.f32 %v1181_v29, %v1133_v36  ;;  %v5078_v36 = vld [vmem:[%s5577_s29 + $0xc8] sm:$0xff] }
 0x1d4   : > { %v1237_v43 = vpack.c.bf16 %v1182_v38, %v1182_v38  ;;  %1579 = vmatmul.bf16.gmra.mxu3 %v5058_v37 }
 0x1d6   : > { %v1286_v45 = vunpack.c.l.b16 %v1237_v43 }
 0x1d7   : > { %v1086_v46 = vpop.f32.mrf.mxu3 }
 0x1d8   : > { %v1296_v48 = vpack.c.b16 %v1286_v45, %v1285_v44  ;;  %v1136_v49 = vadd.f32 %v1135_v23, %v1086_v46  ;;  %v1191_v8 = vpop.f32.mrf.mxu0  ;;  %v1601_v14 = vpop.f32.mrf.mxu2 }
 0x1da   : > { %1525 = vmatmul.bf16.gmra.mxu1 %v1296_v48  ;;  %v1185_v53 = vadd.f32 %v1184_v42, %v1136_v49  ;;  %v5125_v49 = vld [vmem:[#allocation7 + $0x298] sm:$0xff] }
 0x1db   : > { %2431 = vmatpush.bf16.msrb.mxu0 %v5125_v49 }
 0x1dc   : > { %v1238_v59 = vpack.c.bf16 %v1185_v53, %v1185_v53 }
 0x1de   : > { %v1287_v61 = vunpack.c.l.b16 %v1238_v59 }
 0x1df   : > { %v1088_v54 = vpop.f32.mrf.mxu3  ;;  %2432 = vmatpush.bf16.msrb.mxu0 %v5124_v4 }
 0x1e0   : > { %v1138_v55 = vadd.f32 %v1137_v34, %v1088_v54  ;;  %v1604_v19 = vpop.f32.mrf.mxu2 }
 0x1e2   : > { %v1187_v57 = vadd.f32 %v1186_v52, %v1138_v55  ;;  %v5079_v55 = vld [vmem:[%s5577_s29 + $0xd0] sm:$0xff] }
 0x1e4   : > { %v1239_v60 = vpack.c.bf16 %v1187_v57, %v1187_v57  ;;  %1584 = vmatmul.bf16.gmra.mxu3 %v5059_v56 }
 0x1e6   : > { %v1288_v62 = vunpack.c.l.b16 %v1239_v60  ;;  %v5116_v60 = vld [vmem:[#allocation7 + $0x250] sm:$0xff] }
 0x1e7   : > { %v1091_v0 = vpop.f32.mrf.mxu3  ;;  %2383 = vmatpush.bf16.msrb.mxu2 %v5116_v60 }
 0x1e8   : > { %v1297_v1 = vpack.c.b16 %v1288_v62, %v1287_v61  ;;  %v1141_v2 = vadd.f32 %v1140_v47, %v1091_v0  ;;  %v1606_v24 = vpop.f32.mrf.mxu2 }
 0x1ea   : > { %1530 = vmatmul.bf16.gmra.mxu1 %v1297_v1  ;;  %v1190_v5 = vadd.f32 %v1189_v63, %v1141_v2 }
 0x1ec   : > { %v1240_v11 = vpack.c.bf16 %v1190_v5, %v1190_v5 }
 0x1ee   : > { %v1289_v15 = vunpack.c.l.b16 %v1240_v11 }
 0x1ef   : > { %v1093_v6 = vpop.f32.mrf.mxu3 }
 0x1f0   : > { %v1143_v7 = vadd.f32 %v1142_v58, %v1093_v6  ;;  %v1609_v31 = vpop.f32.mrf.mxu2 }
 0x1f2   : > { %v1192_v9 = vadd.f32 %v1191_v8, %v1143_v7  ;;  %v5080_v8 = vld [vmem:[%s5577_s29 + $0xd8] sm:$0xff] }
 0x1f4   : > { %v1241_v13 = vpack.c.bf16 %v1192_v9, %v1192_v9  ;;  %4491 = vmatmul.msk.bf16.vlgmr.msra.gmra.mxu3 %vm598_vm1, %v5587_v10 }
 0x1f6   : > { %v1290_v16 = vunpack.c.l.b16 %v1241_v13 }
 0x1f7   : > { %v1550_v17 = vpop.f32.mrf.mxu3 }
 0x1f8   : > { %v1298_v18 = vpack.c.b16 %v1290_v16, %v1289_v15  ;;  %v1611_v42 = vpop.f32.mrf.mxu2  ;;  %v5115_v15 = vld [vmem:[#allocation7 + $0x248] sm:$0xff] }
 0x1f9   : > { %2384 = vmatpush.bf16.msrb.mxu2 %v5115_v15 }
 0x1fa   : > { %1535 = vmatmul.bf16.gmra.mxu1 %v1298_v18 }
 0x1ff   : > { %v1552_v20 = vpop.f32.mrf.mxu3 }
 0x200   : > { %v1614_v52 = vpop.f32.mrf.mxu2 }
 0x204   : > { %4492 = vmatmul.msk.bf16.gmra.mxu3 %vm598_vm1, %v5587_v10 }
 0x207   : > { %v1501_v22 = vpop.f32.mrf.mxu1  ;;  %v1555_v23 = vpop.f32.mrf.mxu3 }
 0x208   : > { %v1551_v25 = vadd.f32 %v1550_v17, %v1501_v22  ;;  %v1616_v1 = vpop.f32.mrf.mxu2  ;;  %v5123_v22 = vld [vmem:[#allocation7 + $0x288] sm:$0xff] }
 0x209   : > { %2433 = vmatpush.bf16.msrb.mxu0 %v5123_v22 }
 0x20a   : > { %1994 = vmatmul.bf16.vlgmr.msra.gmra.mxu1 %v5077_v21  ;;  %v1600_v26 = vadd.f32 %v1599_v3, %v1551_v25 }
 0x20c   : > { %v1671_v32 = vpack.c.bf16 %v1600_v26, %v1600_v26 }
 0x20e   : > { %v1720_v34 = vunpack.c.l.b16 %v1671_v32  ;;  %v5114_v32 = vld [vmem:[#allocation7 + $0x240] sm:$0xff] }
 0x20f   : > { %v1503_v27 = vpop.f32.mrf.mxu1  ;;  %v1557_v28 = vpop.f32.mrf.mxu3  ;;  %2385 = vmatpush.bf16.msrb.mxu2 %v5114_v32 }
 0x210   : > { %v1553_v29 = vadd.f32 %v1552_v20, %v1503_v27  ;;  %v5081_v27 = vld [vmem:[%s5577_s29 + $0xe0] sm:$0xff] }
 0x212   : > { %v1602_v30 = vadd.f32 %v1601_v14, %v1553_v29  ;;  %v1619_v14 = vpop.f32.mrf.mxu2 }
 0x213   : > { %2386 = vmatpush.bf16.msrb.mxu2 %v5113_v50 }
 0x214   : > { %v1672_v33 = vpack.c.bf16 %v1602_v30, %v1602_v30  ;;  %4493 = vmatmul.msk.bf16.gmra.mxu3 %vm598_vm1, %v5587_v10 }
 0x216   : > { %v1721_v35 = vunpack.c.l.b16 %v1672_v33 }
 0x217   : > { %v1506_v37 = vpop.f32.mrf.mxu1  ;;  %v1560_v38 = vpop.f32.mrf.mxu3 }
 0x218   : > { %v1736_v39 = vpack.c.b16 %v1721_v35, %v1720_v34  ;;  %v1556_v40 = vadd.f32 %v1555_v23, %v1506_v37 }
 0x21a   : > { %1945 = vmatmul.bf16.vlgmr.msra.gmra.mxu0 %v1736_v39  ;;  %1999 = vmatmul.bf16.gmra.mxu1 %v5078_v36  ;;  %v1605_v43 = vadd.f32 %v1604_v19, %v1556_v40  ;;  %v1621_v23 = vpop.f32.mrf.mxu2  ;;  %v5122_v40 = vld [vmem:[#allocation7 + $0x280] sm:$0xff] }
 0x21b   : > { %2434 = vmatpush.bf16.msrb.mxu0 %v5122_v40  ;;  %v5102_v40 = vld [vmem:[%s5577_s29 + $0x100] sm:$0xff] }
 0x21c   : > { %v1673_v48 = vpack.c.bf16 %v1605_v43, %v1605_v43 }
 0x21e   : > { %v1722_v53 = vunpack.c.l.b16 %v1673_v48 }
 0x21f   : > { %v1508_v44 = vpop.f32.mrf.mxu1  ;;  %v1562_v45 = vpop.f32.mrf.mxu3 }
 0x220   : > { %v1558_v46 = vadd.f32 %v1557_v28, %v1508_v44  ;;  %v5082_v44 = vld [vmem:[%s5577_s29 + $0xe8] sm:$0xff] }
 0x222   : > { %v1607_v47 = vadd.f32 %v1606_v24, %v1558_v46  ;;  %v1624_v34 = vpop.f32.mrf.mxu2 }
 0x224   : > { %v1674_v51 = vpack.c.bf16 %v1607_v47, %v1607_v47  ;;  %4494 = vmatmul.msk.bf16.gmra.mxu3 %vm598_vm1, %v5587_v10 }
 0x226   : > { %v1723_v54 = vunpack.c.l.b16 %v1674_v51 }
 0x227   : > { %v1511_v56 = vpop.f32.mrf.mxu1  ;;  %v1565_v57 = vpop.f32.mrf.mxu3 }
 0x228   : > { %v1737_v58 = vpack.c.b16 %v1723_v54, %v1722_v53  ;;  %v1561_v59 = vadd.f32 %v1560_v38, %v1511_v56 }
 0x22a   : > { %1950 = vmatmul.bf16.gmra.mxu0 %v1737_v58  ;;  %2004 = vmatmul.bf16.gmra.mxu1 %v5079_v55  ;;  %v1610_v61 = vadd.f32 %v1609_v31, %v1561_v59  ;;  %v1626_v48 = vpop.f32.mrf.mxu2  ;;  %v5112_v58 = vld [vmem:[#allocation7 + $0x230] sm:$0xff] }
 0x22b   : > { %2387 = vmatpush.bf16.msrb.mxu2 %v5112_v58 }
 0x22c   : > { %v1675_v3 = vpack.c.bf16 %v1610_v61, %v1610_v61  ;;  %v5120_v61 = vld [vmem:[#allocation7 + $0x270] sm:$0xff] }
 0x22e   : > { %v1724_v6 = vunpack.c.l.b16 %v1675_v3 }
 0x22f   : > { %v1513_v62 = vpop.f32.mrf.mxu1  ;;  %v1567_v63 = vpop.f32.mrf.mxu3 }
 0x230   : > { %v1563_v0 = vadd.f32 %v1562_v45, %v1513_v62 }
 0x232   : > { %v1612_v2 = vadd.f32 %v1611_v42, %v1563_v0  ;;  %v1629_v59 = vpop.f32.mrf.mxu2  ;;  %v5083_v0 = vld [vmem:[%s5577_s29 + $0xf0] sm:$0xff] }
 0x234   : > { %v1676_v5 = vpack.c.bf16 %v1612_v2, %v1612_v2  ;;  %4495 = vmatmul.msk.bf16.gmra.mxu3 %vm598_vm1, %v5587_v10 }
 0x236   : > { %v1725_v7 = vunpack.c.l.b16 %v1676_v5  ;;  %v5111_v5 = vld [vmem:[#allocation7 + $0x228] sm:$0xff] }
 0x237   : > { %v1516_v9 = vpop.f32.mrf.mxu1  ;;  %v1570_v11 = vpop.f32.mrf.mxu3  ;;  %2388 = vmatpush.bf16.msrb.mxu2 %v5111_v5 }
 0x238   : > { %v1738_v12 = vpack.c.b16 %v1725_v7, %v1724_v6  ;;  %v1566_v13 = vadd.f32 %v1565_v57, %v1516_v9  ;;  %v5121_v57 = vld [vmem:[#allocation7 + $0x278] sm:$0xff] }
 0x239   : > { %2435 = vmatpush.bf16.msrb.mxu0 %v5121_v57 }
 0x23a   : > { %1955 = vmatmul.bf16.gmra.mxu0 %v1738_v12  ;;  %2009 = vmatmul.bf16.gmra.mxu1 %v5080_v8  ;;  %v1615_v16 = vadd.f32 %v1614_v52, %v1566_v13  ;;  %v1631_v6 = vpop.f32.mrf.mxu2 }
 0x23c   : > { %v1677_v21 = vpack.c.bf16 %v1615_v16, %v1615_v16 }
 0x23d   : > { %2436 = vmatpush.bf16.msrb.mxu0 %v5120_v61 }
 0x23e   : > { %v1726_v25 = vunpack.c.l.b16 %v1677_v21 }
 0x23f   : > { %v1518_v17 = vpop.f32.mrf.mxu1  ;;  %v1572_v18 = vpop.f32.mrf.mxu3 }
 0x240   : > { %v1568_v19 = vadd.f32 %v1567_v63, %v1518_v17  ;;  %v5084_v17 = vld [vmem:[%s5577_s29 + $0xf8] sm:$0xff] }
 0x242   : > { %v1617_v20 = vadd.f32 %v1616_v1, %v1568_v19 }
 0x244   : > { %v1678_v24 = vpack.c.bf16 %v1617_v20, %v1617_v20  ;;  %4496 = vmatmul.msk.bf16.gmra.mxu3 %vm598_vm1, %v5587_v10 }
 0x246   : > { %v1727_v26 = vunpack.c.l.b16 %v1678_v24 }
 0x247   : > { %v1521_v28 = vpop.f32.mrf.mxu1  ;;  %v1575_v29 = vpop.f32.mrf.mxu3 }
 0x248   : > { %v1739_v30 = vpack.c.b16 %v1727_v26, %v1726_v25  ;;  %v1571_v31 = vadd.f32 %v1570_v11, %v1521_v28 }
 0x24a   : > { %1960 = vmatmul.bf16.gmra.mxu0 %v1739_v30  ;;  %2014 = vmatmul.bf16.gmra.mxu1 %v5081_v27  ;;  %v1620_v33 = vadd.f32 %v1619_v14, %v1571_v31  ;;  %v5110_v30 = vld [vmem:[#allocation7 + $0x220] sm:$0xff] }
 0x24b   : > { %v5118_v31 = vld [vmem:[#allocation7 + $0x260] sm:$0xff]  ;;  %2389 = vmatpush.bf16.msrb.mxu2 %v5110_v30 }
 0x24c   : > { %v1679_v39 = vpack.c.bf16 %v1620_v33, %v1620_v33 }
 0x24e   : > { %v1728_v42 = vunpack.c.l.b16 %v1679_v39 }
 0x24f   : > { %v1523_v35 = vpop.f32.mrf.mxu1  ;;  %v1577_v36 = vpop.f32.mrf.mxu3 }
 0x250   : > { %v1573_v37 = vadd.f32 %v1572_v18, %v1523_v35  ;;  %v1634_v18 = vpop.f32.mrf.mxu2 }
 0x252   : > { %v1622_v38 = vadd.f32 %v1621_v23, %v1573_v37  ;;  %v5119_v23 = vld [vmem:[#allocation7 + $0x268] sm:$0xff] }
 0x253   : > { %2437 = vmatpush.bf16.msrb.mxu0 %v5119_v23  ;;  %v5141_v23 = vld [vmem:[#allocation7 + $0x2d8] sm:$0xff] }
 0x254   : > { %v1680_v41 = vpack.c.bf16 %v1622_v38, %v1622_v38  ;;  %4497 = vmatmul.msk.bf16.gmra.mxu3 %vm598_vm1, %v5587_v10 }
 0x256   : > { %v1729_v43 = vunpack.c.l.b16 %v1680_v41 }
 0x257   : > { %v1526_v45 = vpop.f32.mrf.mxu1  ;;  %v1580_v46 = vpop.f32.mrf.mxu3  ;;  %2438 = vmatpush.bf16.msrb.mxu0 %v5118_v31 }
 0x258   : > { %v1740_v47 = vpack.c.b16 %v1729_v43, %v1728_v42  ;;  %v1576_v49 = vadd.f32 %v1575_v29, %v1526_v45  ;;  %v1636_v27 = vpop.f32.mrf.mxu2 }
 0x25a   : > { %1965 = vmatmul.bf16.gmra.mxu0 %v1740_v47  ;;  %2019 = vmatmul.bf16.gmra.mxu1 %v5082_v44  ;;  %v1625_v51 = vadd.f32 %v1624_v34, %v1576_v49 }
 0x25c   : > { %v1681_v56 = vpack.c.bf16 %v1625_v51, %v1625_v51 }
 0x25e   : > { %v1730_v62 = vunpack.c.l.b16 %v1681_v56 }
 0x25f   : > { %v1528_v52 = vpop.f32.mrf.mxu1  ;;  %v1582_v53 = vpop.f32.mrf.mxu3 }
 0x260   : > { %v1578_v54 = vadd.f32 %v1577_v36, %v1528_v52 }
 0x262   : > { %v1627_v55 = vadd.f32 %v1626_v48, %v1578_v54 }
 0x264   : > { %v1682_v60 = vpack.c.bf16 %v1627_v55, %v1627_v55  ;;  %4498 = vmatmul.msk.bf16.gmra.mxu3 %vm598_vm1, %v5587_v10  ;;  %v5103_v55 = vld [vmem:[%s5577_s29 + $0x108] sm:$0xff] }
 0x266   : > { %v1731_v63 = vunpack.c.l.b16 %v1682_v60 }
 0x267   : > { %v1531_v1 = vpop.f32.mrf.mxu1  ;;  %v1585_v2 = vpop.f32.mrf.mxu3 }
 0x268   : > { %v1741_v3 = vpack.c.b16 %v1731_v63, %v1730_v62  ;;  %v1581_v4 = vadd.f32 %v1580_v46, %v1531_v1 }
 0x26a   : > { %1970 = vmatmul.bf16.gmra.mxu0 %v1741_v3  ;;  %2024 = vmatmul.bf16.gmra.mxu1 %v5083_v0  ;;  %v1630_v7 = vadd.f32 %v1629_v59, %v1581_v4  ;;  %v5142_v3 = vld [vmem:[#allocation7 + $0x2e0] sm:$0xff] }
 0x26b   : > { %v5150_v4 = vld [vmem:[#allocation7 + $0x320] sm:$0xff]  ;;  %2827 = vmatpush.bf16.msrb.mxu3 %v5142_v3 }
 0x26c   : > { %v1683_v13 = vpack.c.bf16 %v1630_v7, %v1630_v7  ;;  %2876 = vmatpush.bf16.msra.mxu2 %v5150_v4 }
 0x26e   : > { %v1732_v15 = vunpack.c.l.b16 %v1683_v13 }
 0x26f   : > { %v1533_v8 = vpop.f32.mrf.mxu1  ;;  %v1587_v12 = vpop.f32.mrf.mxu3  ;;  %2828 = vmatpush.bf16.msrb.mxu3 %v5141_v23 }
 0x270   : > { %v1583_v9 = vadd.f32 %v1582_v53, %v1533_v8 }
 0x272   : > { %v1632_v11 = vadd.f32 %v1631_v6, %v1583_v9  ;;  %v5104_v9 = vld [vmem:[%s5577_s29 + $0x110] sm:$0xff] }
 0x274   : > { %v1684_v14 = vpack.c.bf16 %v1632_v11, %v1632_v11 }
 0x276   : > { %v1733_v16 = vunpack.c.l.b16 %v1684_v14 }
 0x277   : > { %v1536_v19 = vpop.f32.mrf.mxu1  ;;  %v2044_v22 = vpop.f32.mrf.mxu3 }
 0x278   : > { %v1742_v20 = vpack.c.b16 %v1733_v16, %v1732_v15  ;;  %v1586_v21 = vadd.f32 %v1585_v2, %v1536_v19  ;;  %v5151_v15 = vld [vmem:[#allocation7 + $0x328] sm:$0xff] }
 0x279   : > { %2932 = vmatpush.bf16.msra.mxu0 %v5151_v15  ;;  %v5137_v15 = vld [vmem:[#allocation7 + $0x2b8] sm:$0xff] }
 0x27a   : > { %1975 = vmatmul.bf16.gmra.mxu0 %v1742_v20  ;;  %2029 = vmatmul.bf16.gmra.mxu1 %v5084_v17  ;;  %v1635_v24 = vadd.f32 %v1634_v18, %v1586_v21 }
 0x27c   : > { %v1685_v29 = vpack.c.bf16 %v1635_v24, %v1635_v24  ;;  %v5149_v24 = vld [vmem:[#allocation7 + $0x318] sm:$0xff] }
 0x27d   : > { %2877 = vmatpush.bf16.msra.mxu2 %v5149_v24  ;;  %v5136_v24 = vld [vmem:[#allocation7 + $0x2b0] sm:$0xff] }
 0x27e   : > { %v1734_v34 = vunpack.c.l.b16 %v1685_v29 }
 0x27f   : > { %v1538_v25 = vpop.f32.mrf.mxu1  ;;  %v2046_v33 = vpop.f32.mrf.mxu3 }
 0x280   : > { %v1588_v26 = vadd.f32 %v1587_v12, %v1538_v25 }
 0x282   : > { %v1637_v28 = vadd.f32 %v1636_v27, %v1588_v26 }
 0x284   : > { %v1686_v32 = vpack.c.bf16 %v1637_v28, %v1637_v28  ;;  %v5105_v28 = vld [vmem:[%s5577_s29 + $0x118] sm:$0xff] }
 0x286   : > { %v1735_v35 = vunpack.c.l.b16 %v1686_v32 }
 0x287   : > { %v1995_v36 = vpop.f32.mrf.mxu1  ;;  %v2049_v38 = vpop.f32.mrf.mxu3 }
 0x288   : > { %v1743_v37 = vpack.c.b16 %v1735_v35, %v1734_v34 }
 0x28a   : > { %1980 = vmatmul.bf16.gmra.mxu0 %v1743_v37  ;;  %4615 = vmatmul.msk.bf16.vlgmr.msrb.gmra.mxu1 %vm598_vm1, %v5587_v10 }
 0x28f   : > { %v1997_v39 = vpop.f32.mrf.mxu1  ;;  %v2051_v43 = vpop.f32.mrf.mxu3 }
 0x297   : > { %v1946_v41 = vpop.f32.mrf.mxu0  ;;  %v2000_v42 = vpop.f32.mrf.mxu1 }
 0x298   : > { %v1996_v44 = vadd.f32 %v1995_v36, %v1946_v41  ;;  %v2054_v50 = vpop.f32.mrf.mxu3  ;;  %v5148_v41 = vld [vmem:[#allocation7 + $0x310] sm:$0xff] }
 0x299   : > { %2878 = vmatpush.bf16.msra.mxu2 %v5148_v41 }
 0x29a   : > { %2439 = vmatmul.bf16.vlgmr.msrb.gmra.mxu0 %v5102_v40  ;;  %4616 = vmatmul.msk.bf16.gmra.mxu1 %vm598_vm1, %v5587_v10  ;;  %v2045_v45 = vadd.f32 %v2044_v22, %v1996_v44  ;;  %v5140_v40 = vld [vmem:[#allocation7 + $0x2d0] sm:$0xff] }
 0x29b   : > { %2829 = vmatpush.bf16.msrb.mxu3 %v5140_v40 }
 0x29c   : > { %v2116_v51 = vpack.c.bf16 %v2045_v45, %v2045_v45 }
 0x29e   : > { %v2165_v53 = vunpack.c.l.b16 %v2116_v51 }
 0x29f   : > { %v1948_v46 = vpop.f32.mrf.mxu0  ;;  %v2002_v47 = vpop.f32.mrf.mxu1 }
 0x2a0   : > { %v1998_v48 = vadd.f32 %v1997_v39, %v1948_v46  ;;  %v2056_v60 = vpop.f32.mrf.mxu3  ;;  %v5106_v46 = vld [vmem:[%s5577_s29 + $0x120] sm:$0xff] }
 0x2a2   : > { %v2047_v49 = vadd.f32 %v2046_v33, %v1998_v48 }
 0x2a4   : > { %v2117_v52 = vpack.c.bf16 %v2047_v49, %v2047_v49 }
 0x2a6   : > { %v2166_v54 = vunpack.c.l.b16 %v2117_v52 }
 0x2a7   : > { %v1951_v56 = vpop.f32.mrf.mxu0  ;;  %v2005_v57 = vpop.f32.mrf.mxu1 }
 0x2a8   : > { %v2181_v58 = vpack.c.b16 %v2166_v54, %v2165_v53  ;;  %v2001_v59 = vadd.f32 %v2000_v42, %v1951_v56  ;;  %v2059_v6 = vpop.f32.mrf.mxu3 }
 0x2aa   : > { %2390 = vmatmul.bf16.vlgmr.msrb.gmra.mxu2 %v2181_v58  ;;  %2444 = vmatmul.bf16.gmra.mxu0 %v5103_v55  ;;  %v2050_v61 = vadd.f32 %v2049_v38, %v2001_v59  ;;  %v5139_v58 = vld [vmem:[#allocation7 + $0x2c8] sm:$0xff] }
 0x2ab   : > { %4617 = vmatmul.msk.bf16.gmra.mxu1 %vm598_vm1, %v5587_v10  ;;  %v5147_v59 = vld [vmem:[#allocation7 + $0x308] sm:$0xff]  ;;  %2830 = vmatpush.bf16.msrb.mxu3 %v5139_v58 }
 0x2ac   : > { %v2118_v2 = vpack.c.bf16 %v2050_v61, %v2050_v61  ;;  %2879 = vmatpush.bf16.msra.mxu2 %v5147_v59  ;;  %v5127_v59 = vld [vmem:[%s5577_s29 + $0x140] sm:$0xff] }
 0x2ae   : > { %v2167_v7 = vunpack.c.l.b16 %v2118_v2 }
 0x2af   : > { %v1953_v62 = vpop.f32.mrf.mxu0  ;;  %v2007_v63 = vpop.f32.mrf.mxu1 }
 0x2b0   : > { %v2003_v0 = vadd.f32 %v2002_v47, %v1953_v62  ;;  %v2061_v20 = vpop.f32.mrf.mxu3 }
 0x2b2   : > { %v2052_v1 = vadd.f32 %v2051_v43, %v2003_v0 }
 0x2b4   : > { %v2119_v5 = vpack.c.bf16 %v2052_v1, %v2052_v1 }
 0x2b6   : > { %v2168_v8 = vunpack.c.l.b16 %v2119_v5 }
 0x2b7   : > { %v1956_v11 = vpop.f32.mrf.mxu0  ;;  %v2010_v12 = vpop.f32.mrf.mxu1 }
 0x2b8   : > { %v2182_v13 = vpack.c.b16 %v2168_v8, %v2167_v7  ;;  %v2006_v14 = vadd.f32 %v2005_v57, %v1956_v11  ;;  %v2064_v33 = vpop.f32.mrf.mxu3  ;;  %v5138_v11 = vld [vmem:[#allocation7 + $0x2c0] sm:$0xff] }
 0x2b9   : > { %2831 = vmatpush.bf16.msrb.mxu3 %v5138_v11 }
 0x2ba   : > { %2395 = vmatmul.bf16.gmra.mxu2 %v2182_v13  ;;  %2449 = vmatmul.bf16.gmra.mxu0 %v5104_v9  ;;  %v2055_v16 = vadd.f32 %v2054_v50, %v2006_v14 }
 0x2bb   : > { %4618 = vmatmul.msk.bf16.gmra.mxu1 %vm598_vm1, %v5587_v10 }
 0x2bc   : > { %v2120_v22 = vpack.c.bf16 %v2055_v16, %v2055_v16  ;;  %v5145_v16 = vld [vmem:[#allocation7 + $0x2f8] sm:$0xff] }
 0x2bd   : > { %2832 = vmatpush.bf16.msrb.mxu3 %v5137_v15 }
 0x2be   : > { %v2169_v26 = vunpack.c.l.b16 %v2120_v22 }
 0x2bf   : > { %v1958_v17 = vpop.f32.mrf.mxu0  ;;  %v2012_v18 = vpop.f32.mrf.mxu1 }
 0x2c0   : > { %v2008_v19 = vadd.f32 %v2007_v63, %v1958_v17  ;;  %v2066_v43 = vpop.f32.mrf.mxu3  ;;  %v5107_v63 = vld [vmem:[%s5577_s29 + $0x128] sm:$0xff] }
 0x2c1   : > { %2833 = vmatpush.bf16.msrb.mxu3 %v5136_v24 }
 0x2c2   : > { %v2057_v21 = vadd.f32 %v2056_v60, %v2008_v19 }
 0x2c4   : > { %v2121_v25 = vpack.c.bf16 %v2057_v21, %v2057_v21 }
 0x2c6   : > { %v2170_v27 = vunpack.c.l.b16 %v2121_v25  ;;  %v5144_v25 = vld [vmem:[#allocation7 + $0x2f0] sm:$0xff] }
 0x2c7   : > { %v1961_v29 = vpop.f32.mrf.mxu0  ;;  %v2015_v30 = vpop.f32.mrf.mxu1 }
 0x2c8   : > { %v2183_v31 = vpack.c.b16 %v2170_v27, %v2169_v26  ;;  %v2011_v32 = vadd.f32 %v2010_v12, %v1961_v29  ;;  %v2069_v53 = vpop.f32.mrf.mxu3  ;;  %v5146_v12 = vld [vmem:[#allocation7 + $0x300] sm:$0xff] }
 0x2c9   : > { %2880 = vmatpush.bf16.msra.mxu2 %v5146_v12 }
 0x2ca   : > { %2400 = vmatmul.bf16.gmra.mxu2 %v2183_v31  ;;  %2454 = vmatmul.bf16.gmra.mxu0 %v5105_v28  ;;  %v2060_v34 = vadd.f32 %v2059_v6, %v2011_v32 }
 0x2cb   : > { %4619 = vmatmul.msk.bf16.gmra.mxu1 %vm598_vm1, %v5587_v10 }
 0x2cc   : > { %v2122_v39 = vpack.c.bf16 %v2060_v34, %v2060_v34 }
 0x2cd   : > { %2881 = vmatpush.bf16.msra.mxu2 %v5145_v16 }
 0x2ce   : > { %v2171_v44 = vunpack.c.l.b16 %v2122_v39 }
 0x2cf   : > { %v1963_v35 = vpop.f32.mrf.mxu0  ;;  %v2017_v36 = vpop.f32.mrf.mxu1 }
 0x2d0   : > { %v2013_v37 = vadd.f32 %v2012_v18, %v1963_v35  ;;  %v2071_v2 = vpop.f32.mrf.mxu3 }
 0x2d1   : > { %2882 = vmatpush.bf16.msra.mxu2 %v5144_v25 }
 0x2d2   : > { %v2062_v38 = vadd.f32 %v2061_v20, %v2013_v37  ;;  %v5108_v20 = vld [vmem:[%s5577_s29 + $0x130] sm:$0xff] }
 0x2d4   : > { %v2123_v42 = vpack.c.bf16 %v2062_v38, %v2062_v38 }
 0x2d6   : > { %v2172_v45 = vunpack.c.l.b16 %v2123_v42 }
 0x2d7   : > { %v1966_v47 = vpop.f32.mrf.mxu0  ;;  %v2020_v48 = vpop.f32.mrf.mxu1 }
 0x2d8   : > { %v2184_v49 = vpack.c.b16 %v2172_v45, %v2171_v44  ;;  %v2016_v50 = vadd.f32 %v2015_v30, %v1966_v47  ;;  %v2074_v13 = vpop.f32.mrf.mxu3 }
 0x2da   : > { %2405 = vmatmul.bf16.gmra.mxu2 %v2184_v49  ;;  %2459 = vmatmul.bf16.gmra.mxu0 %v5106_v46  ;;  %v2065_v51 = vadd.f32 %v2064_v33, %v2016_v50  ;;  %v5143_v49 = vld [vmem:[#allocation7 + $0x2e8] sm:$0xff] }
 0x2db   : > { %4620 = vmatmul.msk.bf16.gmra.mxu1 %vm598_vm1, %v5587_v10  ;;  %2883 = vmatpush.bf16.msra.mxu2 %v5143_v49 }
 0x2dc   : > { %v2124_v57 = vpack.c.bf16 %v2065_v51, %v2065_v51 }
 0x2de   : > { %v2173_v61 = vunpack.c.l.b16 %v2124_v57 }
 0x2df   : > { %v1968_v52 = vpop.f32.mrf.mxu0  ;;  %v2022_v55 = vpop.f32.mrf.mxu1 }
 0x2e0   : > { %v2018_v54 = vadd.f32 %v2017_v36, %v1968_v52  ;;  %v2076_v26 = vpop.f32.mrf.mxu3  ;;  %v5109_v36 = vld [vmem:[%s5577_s29 + $0x138] sm:$0xff] }
 0x2e2   : > { %v2067_v56 = vadd.f32 %v2066_v43, %v2018_v54 }
 0x2e4   : > { %v2125_v60 = vpack.c.bf16 %v2067_v56, %v2067_v56 }
 0x2e6   : > { %v2174_v62 = vunpack.c.l.b16 %v2125_v60 }
 0x2e7   : > { %v1971_v0 = vpop.f32.mrf.mxu0  ;;  %v2025_v4 = vpop.f32.mrf.mxu1 }
 0x2e8   : > { %v2185_v1 = vpack.c.b16 %v2174_v62, %v2173_v61  ;;  %v2021_v3 = vadd.f32 %v2020_v48, %v1971_v0  ;;  %v2079_v37 = vpop.f32.mrf.mxu3 }
 0x2ea   : > { %2410 = vmatmul.bf16.gmra.mxu2 %v2185_v1  ;;  %2464 = vmatmul.bf16.gmra.mxu0 %v5107_v63  ;;  %v2070_v5 = vadd.f32 %v2069_v53, %v2021_v3 }
 0x2eb   : > { %4621 = vmatmul.msk.bf16.gmra.mxu1 %vm598_vm1, %v5587_v10 }
 0x2ec   : > { %v2126_v9 = vpack.c.bf16 %v2070_v5, %v2070_v5 }
 0x2ee   : > { %v2175_v18 = vunpack.c.l.b16 %v2126_v9 }
 0x2ef   : > { %v1973_v6 = vpop.f32.mrf.mxu0  ;;  %v2027_v17 = vpop.f32.mrf.mxu1 }
 0x2f0   : > { %v2023_v7 = vadd.f32 %v2022_v55, %v1973_v6  ;;  %v2081_v45 = vpop.f32.mrf.mxu3  ;;  %v5135_v55 = vld [vmem:[#allocation7 + $0x2a8] sm:$0xff] }
 0x2f1   : > { %2834 = vmatpush.bf16.msrb.mxu3 %v5135_v55 }
 0x2f2   : > { %v2072_v8 = vadd.f32 %v2071_v2, %v2023_v7 }
 0x2f4   : > { %v2127_v14 = vpack.c.bf16 %v2072_v8, %v2072_v8 }
 0x2f6   : > { %v2176_v19 = vunpack.c.l.b16 %v2127_v14 }
 0x2f7   : > { %v1976_v21 = vpop.f32.mrf.mxu0  ;;  %v2030_v29 = vpop.f32.mrf.mxu1 }
 0x2f8   : > { %v2186_v22 = vpack.c.b16 %v2176_v19, %v2175_v18  ;;  %v2026_v23 = vadd.f32 %v2025_v4, %v1976_v21  ;;  %v5128_v4 = vld [vmem:[%s5577_s29 + $0x148] sm:$0xff]  ;;  %v5176_v18 = vld [vmem:[#allocation7 + $0x3b0] sm:$0xff] }
 0x2f9   : > { %3377 = vmatpush.bf16.msrb.mxu2 %v5176_v18 }
 0x2fa   : > { %2415 = vmatmul.bf16.gmra.mxu2 %v2186_v22  ;;  %2469 = vmatmul.bf16.gmra.mxu0 %v5108_v20  ;;  %v2075_v27 = vadd.f32 %v2074_v13, %v2026_v23  ;;  %v5129_v23 = vld [vmem:[%s5577_s29 + $0x150] sm:$0xff] }
 0x2fb   : > { %4622 = vmatmul.msk.bf16.gmra.mxu1 %vm598_vm1, %v5587_v10 }
 0x2fc   : > { %v2128_v32 = vpack.c.bf16 %v2075_v27, %v2075_v27  ;;  %v5167_v27 = vld [vmem:[#allocation7 + $0x368] sm:$0xff] }
 0x2fd   : > { %3272 = vmatpush.bf16.msra.mxu1 %v5167_v27 }
 0x2fe   : > { %v2177_v34 = vunpack.c.l.b16 %v2128_v32 }
 0x2ff   : > { %v1978_v28 = vpop.f32.mrf.mxu0  ;;  %v2032_v40 = vpop.f32.mrf.mxu1 }
 0x300   : > { %v2028_v30 = vadd.f32 %v2027_v17, %v1978_v28  ;;  %v5175_v17 = vld [vmem:[#allocation7 + $0x3a8] sm:$0xff] }
 0x301   : > { %3321 = vmatpush.bf16.msra.mxu3 %v5175_v17 }
 0x302   : > { %v2077_v31 = vadd.f32 %v2076_v26, %v2028_v30 }
 0x304   : > { %v2129_v33 = vpack.c.bf16 %v2077_v31, %v2077_v31 }
 0x306   : > { %v2178_v35 = vunpack.c.l.b16 %v2129_v33 }
 0x307   : > { %v1981_v38 = vpop.f32.mrf.mxu0  ;;  %v2489_v46 = vpop.f32.mrf.mxu1 }
 0x308   : > { %v2187_v39 = vpack.c.b16 %v2178_v35, %v2177_v34  ;;  %v2031_v41 = vadd.f32 %v2030_v29, %v1981_v38 }
 0x30a   : > { %2420 = vmatmul.bf16.gmra.mxu2 %v2187_v39  ;;  %2474 = vmatmul.bf16.gmra.mxu0 %v5109_v36  ;;  %v2080_v42 = vadd.f32 %v2079_v37, %v2031_v41  ;;  %v5174_v36 = vld [vmem:[#allocation7 + $0x3a0] sm:$0xff] }
 0x30b   : > { %3322 = vmatpush.bf16.msra.mxu3 %v5174_v36  ;;  %v5162_v36 = vld [vmem:[#allocation7 + $0x340] sm:$0xff] }
 0x30c   : > { %v2130_v48 = vpack.c.bf16 %v2080_v42, %v2080_v42 }
 0x30e   : > { %v2179_v51 = vunpack.c.l.b16 %v2130_v48 }
 0x30f   : > { %v1983_v43 = vpop.f32.mrf.mxu0  ;;  %v2491_v56 = vpop.f32.mrf.mxu1 }
 0x310   : > { %v2033_v44 = vadd.f32 %v2032_v40, %v1983_v43  ;;  %v5130_v40 = vld [vmem:[%s5577_s29 + $0x158] sm:$0xff] }
 0x312   : > { %v2082_v47 = vadd.f32 %v2081_v45, %v2033_v44  ;;  %v5166_v44 = vld [vmem:[#allocation7 + $0x360] sm:$0xff] }
 0x313   : > { %3273 = vmatpush.bf16.msra.mxu1 %v5166_v44  ;;  %v5161_v44 = vld [vmem:[#allocation7 + $0x338] sm:$0xff] }
 0x314   : > { %v2131_v50 = vpack.c.bf16 %v2082_v47, %v2082_v47 }
 0x316   : > { %v2180_v52 = vunpack.c.l.b16 %v2131_v50 }
 0x317   : > { %v2440_v53 = vpop.f32.mrf.mxu0  ;;  %v2494_v58 = vpop.f32.mrf.mxu1 }
 0x318   : > { %v2188_v54 = vpack.c.b16 %v2180_v52, %v2179_v51  ;;  %v5173_v52 = vld [vmem:[#allocation7 + $0x398] sm:$0xff] }
 0x319   : > { %3323 = vmatpush.bf16.msra.mxu3 %v5173_v52 }
 0x31a   : > { %2425 = vmatmul.bf16.gmra.mxu2 %v2188_v54  ;;  %4739 = vmatmul.msk.bf16.vlgmr.msra.gmra.mxu0 %vm598_vm1, %v5587_v10 }
 0x31f   : > { %v2442_v57 = vpop.f32.mrf.mxu0  ;;  %v2496_v63 = vpop.f32.mrf.mxu1 }
 0x327   : > { %v2445_v60 = vpop.f32.mrf.mxu0 }
 0x328   : > { %v2499_v8 = vpop.f32.mrf.mxu1 }
 0x32a   : > { %2884 = vmatmul.bf16.vlgmr.msra.gmra.mxu2 %v5127_v59  ;;  %4740 = vmatmul.msk.bf16.gmra.mxu0 %vm598_vm1, %v5587_v10 }
 0x32d   : > { %v2391_v61 = vpop.f32.mrf.mxu2 }
 0x32e   : > { %v2441_v0 = vadd.f32 %v2440_v53, %v2391_v61  ;;  %v5165_v61 = vld [vmem:[#allocation7 + $0x358] sm:$0xff] }
 0x32f   : > { %v2447_v62 = vpop.f32.mrf.mxu0  ;;  %3274 = vmatpush.bf16.msra.mxu1 %v5165_v61  ;;  %v5168_v61 = vld [vmem:[#allocation7 + $0x370] sm:$0xff] }
 0x330   : > { %v2490_v1 = vadd.f32 %v2489_v46, %v2441_v0  ;;  %v2501_v19 = vpop.f32.mrf.mxu1 }
 0x332   : > { %v2561_v7 = vpack.c.bf16 %v2490_v1, %v2490_v1 }
 0x334   : > { %v2610_v11 = vunpack.c.l.b16 %v2561_v7 }
 0x335   : > { %v2393_v2 = vpop.f32.mrf.mxu2 }
 0x336   : > { %v2443_v3 = vadd.f32 %v2442_v57, %v2393_v2 }
 0x337   : > { %v2450_v5 = vpop.f32.mrf.mxu0 }
 0x338   : > { %v2492_v6 = vadd.f32 %v2491_v56, %v2443_v3  ;;  %v2504_v32 = vpop.f32.mrf.mxu1 }
 0x33a   : > { %v2562_v9 = vpack.c.bf16 %v2492_v6, %v2492_v6  ;;  %2889 = vmatmul.bf16.gmra.mxu2 %v5128_v4  ;;  %4741 = vmatmul.msk.bf16.gmra.mxu0 %vm598_vm1, %v5587_v10  ;;  %v5172_v6 = vld [vmem:[#allocation7 + $0x390] sm:$0xff] }
 0x33b   : > { %3324 = vmatpush.bf16.msra.mxu3 %v5172_v6 }
 0x33c   : > { %v2611_v12 = vunpack.c.l.b16 %v2562_v9 }
 0x33d   : > { %v2396_v13 = vpop.f32.mrf.mxu2 }
 0x33e   : > { %v2626_v14 = vpack.c.b16 %v2611_v12, %v2610_v11  ;;  %v2446_v16 = vadd.f32 %v2445_v60, %v2396_v13  ;;  %v5132_v12 = vld [vmem:[%s5577_s29 + $0x168] sm:$0xff] }
 0x33f   : > { %v2452_v15 = vpop.f32.mrf.mxu0 }
 0x340   : > { %2835 = vmatmul.bf16.vlgmr.msrb.gmra.mxu3 %v2626_v14  ;;  %v2495_v20 = vadd.f32 %v2494_v58, %v2446_v16  ;;  %v2506_v41 = vpop.f32.mrf.mxu1  ;;  %v5131_v58 = vld [vmem:[%s5577_s29 + $0x160] sm:$0xff]  ;;  %v5164_v16 = vld [vmem:[#allocation7 + $0x350] sm:$0xff] }
 0x341   : > { %3275 = vmatpush.bf16.msra.mxu1 %v5164_v16 }
 0x342   : > { %v2563_v26 = vpack.c.bf16 %v2495_v20, %v2495_v20 }
 0x344   : > { %v2612_v29 = vunpack.c.l.b16 %v2563_v26 }
 0x345   : > { %v2398_v21 = vpop.f32.mrf.mxu2 }
 0x346   : > { %v2448_v22 = vadd.f32 %v2447_v62, %v2398_v21 }
 0x347   : > { %v2455_v24 = vpop.f32.mrf.mxu0 }
 0x348   : > { %v2497_v25 = vadd.f32 %v2496_v63, %v2448_v22  ;;  %v2509_v53 = vpop.f32.mrf.mxu1 }
 0x34a   : > { %v2564_v28 = vpack.c.bf16 %v2497_v25, %v2497_v25  ;;  %2894 = vmatmul.bf16.gmra.mxu2 %v5129_v23  ;;  %4742 = vmatmul.msk.bf16.gmra.mxu0 %vm598_vm1, %v5587_v10 }
 0x34c   : > { %v2613_v30 = vunpack.c.l.b16 %v2564_v28 }
 0x34d   : > { %v2401_v31 = vpop.f32.mrf.mxu2 }
 0x34e   : > { %v2627_v33 = vpack.c.b16 %v2613_v30, %v2612_v29  ;;  %v2451_v35 = vadd.f32 %v2450_v5, %v2401_v31  ;;  %v5133_v29 = vld [vmem:[%s5577_s29 + $0x170] sm:$0xff] }
 0x34f   : > { %v2457_v34 = vpop.f32.mrf.mxu0 }
 0x350   : > { %2840 = vmatmul.bf16.gmra.mxu3 %v2627_v33  ;;  %v2500_v37 = vadd.f32 %v2499_v8, %v2451_v35  ;;  %v2511_v63 = vpop.f32.mrf.mxu1  ;;  %v5170_v33 = vld [vmem:[#allocation7 + $0x380] sm:$0xff] }
 0x352   : > { %v2565_v43 = vpack.c.bf16 %v2500_v37, %v2500_v37 }
 0x354   : > { %v2614_v47 = vunpack.c.l.b16 %v2565_v43  ;;  %v5169_v43 = vld [vmem:[#allocation7 + $0x378] sm:$0xff] }
 0x355   : > { %v2403_v38 = vpop.f32.mrf.mxu2 }
 0x356   : > { %v2453_v39 = vadd.f32 %v2452_v15, %v2403_v38 }
 0x357   : > { %v2460_v45 = vpop.f32.mrf.mxu0 }
 0x358   : > { %v2502_v42 = vadd.f32 %v2501_v19, %v2453_v39  ;;  %v2514_v9 = vpop.f32.mrf.mxu1 }
 0x35a   : > { %v2566_v46 = vpack.c.bf16 %v2502_v42, %v2502_v42  ;;  %2899 = vmatmul.bf16.gmra.mxu2 %v5130_v40  ;;  %4743 = vmatmul.msk.bf16.gmra.mxu0 %vm598_vm1, %v5587_v10 }
 0x35c   : > { %v2615_v48 = vunpack.c.l.b16 %v2566_v46 }
 0x35d   : > { %v2406_v49 = vpop.f32.mrf.mxu2 }
 0x35e   : > { %v2628_v50 = vpack.c.b16 %v2615_v48, %v2614_v47  ;;  %v2456_v51 = vadd.f32 %v2455_v24, %v2406_v49  ;;  %v5171_v24 = vld [vmem:[#allocation7 + $0x388] sm:$0xff] }
 0x35f   : > { %v2462_v54 = vpop.f32.mrf.mxu0  ;;  %3325 = vmatpush.bf16.msra.mxu3 %v5171_v24  ;;  %v5153_v24 = vld [vmem:[%s5577_s29 + $0x188] sm:$0xff] }
 0x360   : > { %2845 = vmatmul.bf16.gmra.mxu3 %v2628_v50  ;;  %v2505_v55 = vadd.f32 %v2504_v32, %v2456_v51  ;;  %v2516_v22 = vpop.f32.mrf.mxu1  ;;  %v5163_v32 = vld [vmem:[#allocation7 + $0x348] sm:$0xff]  ;;  %v5134_v50 = vld [vmem:[%s5577_s29 + $0x178] sm:$0xff] }
 0x361   : > { %3276 = vmatpush.bf16.msra.mxu1 %v5163_v32 }
 0x362   : > { %v2567_v60 = vpack.c.bf16 %v2505_v55, %v2505_v55 }
 0x363   : > { %3326 = vmatpush.bf16.msra.mxu3 %v5170_v33 }
 0x364   : > { %v2616_v0 = vunpack.c.l.b16 %v2567_v60 }
 0x365   : > { %v2408_v56 = vpop.f32.mrf.mxu2  ;;  %3277 = vmatpush.bf16.msra.mxu1 %v5162_v36 }
 0x366   : > { %v2458_v57 = vadd.f32 %v2457_v34, %v2408_v56 }
 0x367   : > { %v2465_v3 = vpop.f32.mrf.mxu0  ;;  %3327 = vmatpush.bf16.msra.mxu3 %v5169_v43  ;;  %v5154_v43 = vld [vmem:[%s5577_s29 + $0x190] sm:$0xff] }
 0x368   : > { %v2507_v59 = vadd.f32 %v2506_v41, %v2458_v57  ;;  %v2519_v34 = vpop.f32.mrf.mxu1 }
 0x369   : > { %3278 = vmatpush.bf16.msra.mxu1 %v5161_v44 }
 0x36a   : > { %v2568_v62 = vpack.c.bf16 %v2507_v59, %v2507_v59  ;;  %2904 = vmatmul.bf16.gmra.mxu2 %v5131_v58  ;;  %4744 = vmatmul.msk.bf16.gmra.mxu0 %vm598_vm1, %v5587_v10 }
 0x36b   : > { %3328 = vmatpush.bf16.msra.mxu3 %v5168_v61 }
 0x36c   : > { %v2617_v1 = vunpack.c.l.b16 %v2568_v62 }
 0x36d   : > { %v2411_v2 = vpop.f32.mrf.mxu2 }
 0x36e   : > { %v2629_v4 = vpack.c.b16 %v2617_v1, %v2616_v0  ;;  %v2461_v5 = vadd.f32 %v2460_v45, %v2411_v2 }
 0x36f   : > { %v2467_v13 = vpop.f32.mrf.mxu0 }
 0x370   : > { %2850 = vmatmul.bf16.gmra.mxu3 %v2629_v4  ;;  %v2510_v7 = vadd.f32 %v2509_v53, %v2461_v5  ;;  %v2521_v45 = vpop.f32.mrf.mxu1 }
 0x372   : > { %v2569_v15 = vpack.c.bf16 %v2510_v7, %v2510_v7 }
 0x374   : > { %v2618_v18 = vunpack.c.l.b16 %v2569_v15  ;;  %v5152_v15 = vld [vmem:[%s5577_s29 + $0x180] sm:$0xff] }
 0x375   : > { %v2413_v8 = vpop.f32.mrf.mxu2 }
 0x376   : > { %v2463_v11 = vadd.f32 %v2462_v54, %v2413_v8 }
 0x377   : > { %v2470_v25 = vpop.f32.mrf.mxu0 }
 0x378   : > { %v2512_v14 = vadd.f32 %v2511_v63, %v2463_v11  ;;  %v2524_v56 = vpop.f32.mrf.mxu1  ;;  %v5160_v11 = vld [vmem:[#allocation7 + $0x330] sm:$0xff] }
 0x379   : > { %3279 = vmatpush.bf16.msra.mxu1 %v5160_v11 }
 0x37a   : > { %v2570_v17 = vpack.c.bf16 %v2512_v14, %v2512_v14  ;;  %2909 = vmatmul.bf16.gmra.mxu2 %v5132_v12  ;;  %4745 = vmatmul.msk.bf16.gmra.mxu0 %vm598_vm1, %v5587_v10 }
 0x37c   : > { %v2619_v19 = vunpack.c.l.b16 %v2570_v17 }
 0x37d   : > { %v2416_v20 = vpop.f32.mrf.mxu2 }
 0x37e   : > { %v2630_v21 = vpack.c.b16 %v2619_v19, %v2618_v18  ;;  %v2466_v23 = vadd.f32 %v2465_v3, %v2416_v20 }
 0x37f   : > { %v2472_v37 = vpop.f32.mrf.mxu0 }
 0x380   : > { %2855 = vmatmul.bf16.gmra.mxu3 %v2630_v21  ;;  %v2515_v26 = vadd.f32 %v2514_v9, %v2466_v23  ;;  %v2526_v1 = vpop.f32.mrf.mxu1 }
 0x382   : > { %v2571_v31 = vpack.c.bf16 %v2515_v26, %v2515_v26 }
 0x384   : > { %v2620_v38 = vunpack.c.l.b16 %v2571_v31 }
 0x385   : > { %v2418_v27 = vpop.f32.mrf.mxu2 }
 0x386   : > { %v2468_v28 = vadd.f32 %v2467_v13, %v2418_v27 }
 0x387   : > { %v2475_v48 = vpop.f32.mrf.mxu0 }
 0x388   : > { %v2517_v30 = vadd.f32 %v2516_v22, %v2468_v28  ;;  %v5201_v28 = vld [vmem:[#allocation7 + $0x438] sm:$0xff] }
 0x389   : > { %3822 = vmatpush.bf16.msrb.mxu3 %v5201_v28  ;;  %v5197_v28 = vld [vmem:[#allocation7 + $0x418] sm:$0xff] }
 0x38a   : > { %v2572_v35 = vpack.c.bf16 %v2517_v30, %v2517_v30  ;;  %2914 = vmatmul.bf16.gmra.mxu2 %v5133_v29  ;;  %4746 = vmatmul.msk.bf16.gmra.mxu0 %vm598_vm1, %v5587_v10 }
 0x38c   : > { %v2621_v39 = vunpack.c.l.b16 %v2572_v35 }
 0x38d   : > { %v2421_v40 = vpop.f32.mrf.mxu2 }
 0x38e   : > { %v2631_v41 = vpack.c.b16 %v2621_v39, %v2620_v38  ;;  %v2471_v42 = vadd.f32 %v2470_v25, %v2421_v40  ;;  %v5200_v38 = vld [vmem:[#allocation7 + $0x430] sm:$0xff] }
 0x38f   : > { %v2477_v59 = vpop.f32.mrf.mxu0  ;;  %3766 = vmatpush.bf16.msrb.mxu1 %v5200_v38 }
 0x390   : > { %2860 = vmatmul.bf16.gmra.mxu3 %v2631_v41  ;;  %v2520_v46 = vadd.f32 %v2519_v34, %v2471_v42 }
 0x392   : > { %v2573_v52 = vpack.c.bf16 %v2520_v46, %v2520_v46 }
 0x394   : > { %v2622_v54 = vunpack.c.l.b16 %v2573_v52 }
 0x395   : > { %v2423_v47 = vpop.f32.mrf.mxu2 }
 0x396   : > { %v2473_v49 = vadd.f32 %v2472_v37, %v2423_v47  ;;  %v5192_v37 = vld [vmem:[#allocation7 + $0x3f0] sm:$0xff] }
 0x397   : > { %v2934_v2 = vpop.f32.mrf.mxu0  ;;  %3717 = vmatpush.bf16.msrb.mxu0 %v5192_v37 }
 0x398   : > { %v2522_v51 = vadd.f32 %v2521_v45, %v2473_v49 }
 0x39a   : > { %v2574_v53 = vpack.c.bf16 %v2522_v51, %v2522_v51  ;;  %2919 = vmatmul.bf16.gmra.mxu2 %v5134_v50 }
 0x39c   : > { %v2623_v55 = vunpack.c.l.b16 %v2574_v53 }
 0x39d   : > { %v2426_v57 = vpop.f32.mrf.mxu2 }
 0x39e   : > { %v2632_v58 = vpack.c.b16 %v2623_v55, %v2622_v54  ;;  %v2476_v60 = vadd.f32 %v2475_v48, %v2426_v57  ;;  %v5191_v55 = vld [vmem:[#allocation7 + $0x3e8] sm:$0xff] }
 0x39f   : > { %v2936_v12 = vpop.f32.mrf.mxu0  ;;  %3718 = vmatpush.bf16.msrb.mxu0 %v5191_v55 }
 0x3a0   : > { %2865 = vmatmul.bf16.gmra.mxu3 %v2632_v58  ;;  %v2525_v62 = vadd.f32 %v2524_v56, %v2476_v60  ;;  %v5199_v56 = vld [vmem:[#allocation7 + $0x428] sm:$0xff]  ;;  %v5155_v60 = vld [vmem:[%s5577_s29 + $0x198] sm:$0xff] }
 0x3a1   : > { %3767 = vmatpush.bf16.msrb.mxu1 %v5199_v56 }
 0x3a2   : > { %v2575_v4 = vpack.c.bf16 %v2525_v62, %v2525_v62 }
 0x3a4   : > { %v2624_v6 = vunpack.c.l.b16 %v2575_v4 }
 0x3a5   : > { %v2428_v63 = vpop.f32.mrf.mxu2 }
 0x3a6   : > { %v2478_v0 = vadd.f32 %v2477_v59, %v2428_v63 }
 0x3a7   : > { %v2939_v14 = vpop.f32.mrf.mxu0 }
 0x3a8   : > { %v2527_v3 = vadd.f32 %v2526_v1, %v2478_v0 }
 0x3aa   : > { %v2576_v5 = vpack.c.bf16 %v2527_v3, %v2527_v3  ;;  %4863 = vmatmul.msk.bf16.vlgmr.msrb.gmra.mxu2 %vm598_vm1, %v5587_v10 }
 0x3ac   : > { %v2625_v7 = vunpack.c.l.b16 %v2576_v5 }
 0x3ad   : > { %v2885_v8 = vpop.f32.mrf.mxu2 }
 0x3ae   : > { %v2633_v9 = vpack.c.b16 %v2625_v7, %v2624_v6 }
 0x3af   : > { %v2941_v19 = vpop.f32.mrf.mxu0 }
 0x3b0   : > { %2870 = vmatmul.bf16.gmra.mxu3 %v2633_v9  ;;  %v5198_v9 = vld [vmem:[#allocation7 + $0x420] sm:$0xff] }
 0x3b1   : > { %3768 = vmatpush.bf16.msrb.mxu1 %v5198_v9 }
 0x3b5   : > { %v2887_v13 = vpop.f32.mrf.mxu2  ;;  %3769 = vmatpush.bf16.msrb.mxu1 %v5197_v28 }
 0x3b7   : > { %v2944_v29 = vpop.f32.mrf.mxu0 }
 0x3ba   : > { %4864 = vmatmul.msk.bf16.gmra.mxu2 %vm598_vm1, %v5587_v10 }
 0x3bd   : > { %v2890_v16 = vpop.f32.mrf.mxu2 }
 0x3bf   : > { %v2946_v39 = vpop.f32.mrf.mxu0 }
 0x3c0   : > { %3329 = vmatmul.bf16.vlgmr.msra.gmra.mxu3 %v5152_v15  ;;  %v5156_v15 = vld [vmem:[%s5577_s29 + $0x1a0] sm:$0xff] }
 0x3c3   : > { %v2836_v17 = vpop.f32.mrf.mxu3 }
 0x3c4   : > { %v2886_v20 = vadd.f32 %v2885_v8, %v2836_v17  ;;  %v5190_v8 = vld [vmem:[#allocation7 + $0x3e0] sm:$0xff] }
 0x3c5   : > { %v2892_v18 = vpop.f32.mrf.mxu2  ;;  %3719 = vmatpush.bf16.msrb.mxu0 %v5190_v8 }
 0x3c6   : > { %v2935_v21 = vadd.f32 %v2934_v2, %v2886_v20 }
 0x3c7   : > { %v2949_v51 = vpop.f32.mrf.mxu0 }
 0x3c8   : > { %v3006_v27 = vpack.c.bf16 %v2935_v21, %v2935_v21 }
 0x3ca   : > { %4865 = vmatmul.msk.bf16.gmra.mxu2 %vm598_vm1, %v5587_v10  ;;  %v3055_v31 = vunpack.c.l.b16 %v3006_v27  ;;  %v5189_v27 = vld [vmem:[#allocation7 + $0x3d8] sm:$0xff] }
 0x3cb   : > { %v2838_v22 = vpop.f32.mrf.mxu3  ;;  %3720 = vmatpush.bf16.msrb.mxu0 %v5189_v27 }
 0x3cc   : > { %v2888_v23 = vadd.f32 %v2887_v13, %v2838_v22 }
 0x3cd   : > { %v2895_v25 = vpop.f32.mrf.mxu2 }
 0x3ce   : > { %v2937_v26 = vadd.f32 %v2936_v12, %v2888_v23 }
 0x3cf   : > { %v2951_v61 = vpop.f32.mrf.mxu0 }
 0x3d0   : > { %v3007_v30 = vpack.c.bf16 %v2937_v26, %v2937_v26  ;;  %3334 = vmatmul.bf16.gmra.mxu3 %v5153_v24 }
 0x3d2   : > { %v3056_v32 = vunpack.c.l.b16 %v3007_v30 }
 0x3d3   : > { %v2841_v33 = vpop.f32.mrf.mxu3 }
 0x3d4   : > { %v3071_v34 = vpack.c.b16 %v3056_v32, %v3055_v31  ;;  %v2891_v36 = vadd.f32 %v2890_v16, %v2841_v33  ;;  %v5157_v33 = vld [vmem:[%s5577_s29 + $0x1a8] sm:$0xff] }
 0x3d5   : > { %v2897_v35 = vpop.f32.mrf.mxu2 }
 0x3d6   : > { %3280 = vmatmul.bf16.vlgmr.msra.gmra.mxu1 %v3071_v34  ;;  %v2940_v40 = vadd.f32 %v2939_v14, %v2891_v36 }
 0x3d7   : > { %v2954_v11 = vpop.f32.mrf.mxu0 }
 0x3d8   : > { %v3008_v46 = vpack.c.bf16 %v2940_v40, %v2940_v40 }
 0x3da   : > { %4866 = vmatmul.msk.bf16.gmra.mxu2 %vm598_vm1, %v5587_v10  ;;  %v3057_v48 = vunpack.c.l.b16 %v3008_v46 }
 0x3db   : > { %v2843_v41 = vpop.f32.mrf.mxu3 }
 0x3dc   : > { %v2893_v42 = vadd.f32 %v2892_v18, %v2843_v41 }
 0x3dd   : > { %v2900_v44 = vpop.f32.mrf.mxu2 }
 0x3de   : > { %v2942_v45 = vadd.f32 %v2941_v19, %v2893_v42 }
 0x3df   : > { %v2956_v20 = vpop.f32.mrf.mxu0 }
 0x3e0   : > { %v3009_v47 = vpack.c.bf16 %v2942_v45, %v2942_v45  ;;  %3339 = vmatmul.bf16.gmra.mxu3 %v5154_v43  ;;  %v5196_v45 = vld [vmem:[#allocation7 + $0x410] sm:$0xff] }
 0x3e1   : > { %3770 = vmatpush.bf16.msrb.mxu1 %v5196_v45 }
 0x3e2   : > { %v3058_v49 = vunpack.c.l.b16 %v3009_v47 }
 0x3e3   : > { %v2846_v50 = vpop.f32.mrf.mxu3 }
 0x3e4   : > { %v3072_v52 = vpack.c.b16 %v3058_v49, %v3057_v48  ;;  %v2896_v54 = vadd.f32 %v2895_v25, %v2846_v50  ;;  %v5158_v50 = vld [vmem:[%s5577_s29 + $0x1b0] sm:$0xff] }
 0x3e5   : > { %v2902_v53 = vpop.f32.mrf.mxu2 }
 0x3e6   : > { %3285 = vmatmul.bf16.gmra.mxu1 %v3072_v52  ;;  %v2945_v57 = vadd.f32 %v2944_v29, %v2896_v54  ;;  %v5195_v54 = vld [vmem:[#allocation7 + $0x408] sm:$0xff] }
 0x3e7   : > { %v2959_v31 = vpop.f32.mrf.mxu0  ;;  %3771 = vmatpush.bf16.msrb.mxu1 %v5195_v54 }
 0x3e8   : > { %v3010_v0 = vpack.c.bf16 %v2945_v57, %v2945_v57 }
 0x3ea   : > { %4867 = vmatmul.msk.bf16.gmra.mxu2 %vm598_vm1, %v5587_v10  ;;  %v3059_v2 = vunpack.c.l.b16 %v3010_v0  ;;  %v5194_v0 = vld [vmem:[#allocation7 + $0x400] sm:$0xff] }
 0x3eb   : > { %v2848_v58 = vpop.f32.mrf.mxu3  ;;  %3772 = vmatpush.bf16.msrb.mxu1 %v5194_v0 }
 0x3ec   : > { %v2898_v59 = vadd.f32 %v2897_v35, %v2848_v58 }
 0x3ed   : > { %v2905_v62 = vpop.f32.mrf.mxu2 }
 0x3ee   : > { %v2947_v63 = vadd.f32 %v2946_v39, %v2898_v59 }
 0x3ef   : > { %v2961_v42 = vpop.f32.mrf.mxu0 }
 0x3f0   : > { %v3011_v1 = vpack.c.bf16 %v2947_v63, %v2947_v63  ;;  %3344 = vmatmul.bf16.gmra.mxu3 %v5155_v60  ;;  %v5186_v63 = vld [vmem:[#allocation7 + $0x3c0] sm:$0xff] }
 0x3f2   : > { %v3060_v3 = vunpack.c.l.b16 %v3011_v1 }
 0x3f3   : > { %v2851_v4 = vpop.f32.mrf.mxu3 }
 0x3f4   : > { %v3073_v5 = vpack.c.b16 %v3060_v3, %v3059_v2  ;;  %v2901_v7 = vadd.f32 %v2900_v44, %v2851_v4  ;;  %v5188_v44 = vld [vmem:[#allocation7 + $0x3d0] sm:$0xff] }
 0x3f5   : > { %v2907_v6 = vpop.f32.mrf.mxu2  ;;  %3721 = vmatpush.bf16.msrb.mxu0 %v5188_v44 }
 0x3f6   : > { %3290 = vmatmul.bf16.gmra.mxu1 %v3073_v5  ;;  %v2950_v12 = vadd.f32 %v2949_v51, %v2901_v7  ;;  %v5159_v5 = vld [vmem:[%s5577_s29 + $0x1b8] sm:$0xff] }
 0x3f7   : > { %v2964_v55 = vpop.f32.mrf.mxu0 }
 0x3f8   : > { %v3012_v18 = vpack.c.bf16 %v2950_v12, %v2950_v12 }
 0x3fa   : > { %4868 = vmatmul.msk.bf16.gmra.mxu2 %vm598_vm1, %v5587_v10  ;;  %v3061_v21 = vunpack.c.l.b16 %v3012_v18  ;;  %v5193_v18 = vld [vmem:[#allocation7 + $0x3f8] sm:$0xff] }
 0x3fb   : > { %v2853_v13 = vpop.f32.mrf.mxu3  ;;  %3773 = vmatpush.bf16.msrb.mxu1 %v5193_v18 }
 0x3fc   : > { %v2903_v14 = vadd.f32 %v2902_v53, %v2853_v13  ;;  %v5187_v53 = vld [vmem:[#allocation7 + $0x3c8] sm:$0xff] }
 0x3fd   : > { %v2910_v16 = vpop.f32.mrf.mxu2  ;;  %3722 = vmatpush.bf16.msrb.mxu0 %v5187_v53 }
 0x3fe   : > { %v2952_v17 = vadd.f32 %v2951_v61, %v2903_v14 }
 0x3ff   : > { %v2966_v1 = vpop.f32.mrf.mxu0 }
 0x400   : > { %v3013_v19 = vpack.c.bf16 %v2952_v17, %v2952_v17  ;;  %3349 = vmatmul.bf16.gmra.mxu3 %v5156_v15 }
 0x401   : > { %3723 = vmatpush.bf16.msrb.mxu0 %v5186_v63 }
 0x402   : > { %v3062_v22 = vunpack.c.l.b16 %v3013_v19 }
 0x403   : > { %v2856_v23 = vpop.f32.mrf.mxu3 }
 0x404   : > { %v3074_v24 = vpack.c.b16 %v3062_v22, %v3061_v21  ;;  %v2906_v25 = vadd.f32 %v2905_v62, %v2856_v23 }
 0x405   : > { %v2912_v26 = vpop.f32.mrf.mxu2 }
 0x406   : > { %3295 = vmatmul.bf16.gmra.mxu1 %v3074_v24  ;;  %v2955_v29 = vadd.f32 %v2954_v11, %v2906_v25  ;;  %v5185_v25 = vld [vmem:[#allocation7 + $0x3b8] sm:$0xff] }
 0x407   : > { %v2969_v13 = vpop.f32.mrf.mxu0  ;;  %3724 = vmatpush.bf16.msrb.mxu0 %v5185_v25 }
 0x408   : > { %v3014_v35 = vpack.c.bf16 %v2955_v29, %v2955_v29 }
 0x40a   : > { %4869 = vmatmul.msk.bf16.gmra.mxu2 %vm598_vm1, %v5587_v10  ;;  %v3063_v38 = vunpack.c.l.b16 %v3014_v35 }
 0x40b   : > { %v2858_v30 = vpop.f32.mrf.mxu3 }
 0x40c   : > { %v2908_v32 = vadd.f32 %v2907_v6, %v2858_v30 }
 0x40d   : > { %v2915_v36 = vpop.f32.mrf.mxu2 }
 0x40e   : > { %v2957_v34 = vadd.f32 %v2956_v20, %v2908_v32 }
 0x40f   : > { %v2971_v22 = vpop.f32.mrf.mxu0 }
 0x410   : > { %v3015_v37 = vpack.c.bf16 %v2957_v34, %v2957_v34  ;;  %3354 = vmatmul.bf16.gmra.mxu3 %v5157_v33  ;;  %v5177_v34 = vld [vmem:[%s5577_s29 + $0x1c0] sm:$0xff] }
 0x412   : > { %v3064_v39 = vunpack.c.l.b16 %v3015_v37 }
 0x413   : > { %v2861_v40 = vpop.f32.mrf.mxu3 }
 0x414   : > { %v3075_v41 = vpack.c.b16 %v3064_v39, %v3063_v38  ;;  %v2911_v43 = vadd.f32 %v2910_v16, %v2861_v40 }
 0x415   : > { %v2917_v47 = vpop.f32.mrf.mxu2 }
 0x416   : > { %3300 = vmatmul.bf16.gmra.mxu1 %v3075_v41  ;;  %v2960_v46 = vadd.f32 %v2959_v31, %v2911_v43 }
 0x418   : > { %v3016_v52 = vpack.c.bf16 %v2960_v46, %v2960_v46 }
 0x41a   : > { %4870 = vmatmul.msk.bf16.gmra.mxu2 %vm598_vm1, %v5587_v10  ;;  %v3065_v57 = vunpack.c.l.b16 %v3016_v52 }
 0x41b   : > { %v2863_v48 = vpop.f32.mrf.mxu3 }
 0x41c   : > { %v2913_v49 = vadd.f32 %v2912_v26, %v2863_v48 }
 0x41d   : > { %v2920_v60 = vpop.f32.mrf.mxu2 }
 0x41e   : > { %v2962_v51 = vadd.f32 %v2961_v42, %v2913_v49  ;;  %v5178_v49 = vld [vmem:[%s5577_s29 + $0x1c8] sm:$0xff] }
 0x420   : > { %v3017_v56 = vpack.c.bf16 %v2962_v51, %v2962_v51  ;;  %3359 = vmatmul.bf16.gmra.mxu3 %v5158_v50 }
 0x422   : > { %v3066_v58 = vunpack.c.l.b16 %v3017_v56 }
 0x423   : > { %v2866_v59 = vpop.f32.mrf.mxu3 }
 0x424   : > { %v3076_v61 = vpack.c.b16 %v3066_v58, %v3065_v57  ;;  %v2916_v62 = vadd.f32 %v2915_v36, %v2866_v59 }
 0x425   : > { %v2922_v7 = vpop.f32.mrf.mxu2 }
 0x426   : > { %3305 = vmatmul.bf16.gmra.mxu1 %v3076_v61  ;;  %v2965_v2 = vadd.f32 %v2964_v55, %v2916_v62 }
 0x428   : > { %v3018_v8 = vpack.c.bf16 %v2965_v2, %v2965_v2 }
 0x42a   : > { %v3067_v11 = vunpack.c.l.b16 %v3018_v8 }
 0x42b   : > { %v2868_v3 = vpop.f32.mrf.mxu3 }
 0x42c   : > { %v2918_v4 = vadd.f32 %v2917_v47, %v2868_v3 }
 0x42d   : > { %v3379_v17 = vpop.f32.mrf.mxu2 }
 0x42e   : > { %v2967_v6 = vadd.f32 %v2966_v1, %v2918_v4  ;;  %v5179_v1 = vld [vmem:[%s5577_s29 + $0x1d0] sm:$0xff] }
 0x430   : > { %v3019_v9 = vpack.c.bf16 %v2967_v6, %v2967_v6  ;;  %3364 = vmatmul.bf16.gmra.mxu3 %v5159_v5 }
 0x432   : > { %v3068_v12 = vunpack.c.l.b16 %v3019_v9 }
 0x433   : > { %v2871_v14 = vpop.f32.mrf.mxu3 }
 0x434   : > { %v3077_v15 = vpack.c.b16 %v3068_v12, %v3067_v11  ;;  %v2921_v16 = vadd.f32 %v2920_v60, %v2871_v14 }
 0x435   : > { %v3381_v27 = vpop.f32.mrf.mxu2 }
 0x436   : > { %3310 = vmatmul.bf16.gmra.mxu1 %v3077_v15  ;;  %v2970_v19 = vadd.f32 %v2969_v13, %v2921_v16 }
 0x438   : > { %v3020_v24 = vpack.c.bf16 %v2970_v19, %v2970_v19 }
 0x43a   : > { %v3069_v28 = vunpack.c.l.b16 %v3020_v24 }
 0x43b   : > { %v2873_v20 = vpop.f32.mrf.mxu3 }
 0x43c   : > { %v2923_v21 = vadd.f32 %v2922_v7, %v2873_v20 }
 0x43d   : > { %v3384_v32 = vpop.f32.mrf.mxu2 }
 0x43e   : > { %v2972_v23 = vadd.f32 %v2971_v22, %v2923_v21 }
 0x440   : > { %v3021_v26 = vpack.c.bf16 %v2972_v23, %v2972_v23  ;;  %4987 = vmatmul.msk.bf16.vlgmr.msrb.gmra.mxu3 %vm598_vm1, %v5587_v10 }
 0x442   : > { %v3070_v29 = vunpack.c.l.b16 %v3021_v26 }
 0x443   : > { %v3330_v30 = vpop.f32.mrf.mxu3 }
 0x444   : > { %v3078_v31 = vpack.c.b16 %v3070_v29, %v3069_v28 }
 0x445   : > { %v3386_v37 = vpop.f32.mrf.mxu2 }
 0x446   : > { %3315 = vmatmul.bf16.gmra.mxu1 %v3078_v31 }
 0x44b   : > { %v3332_v33 = vpop.f32.mrf.mxu3 }
 0x44d   : > { %v3389_v44 = vpop.f32.mrf.mxu2 }
 0x450   : > { %4988 = vmatmul.msk.bf16.gmra.mxu3 %vm598_vm1, %v5587_v10 }
 0x453   : > { %v3281_v35 = vpop.f32.mrf.mxu1  ;;  %v3335_v36 = vpop.f32.mrf.mxu3 }
 0x454   : > { %v3331_v38 = vadd.f32 %v3330_v30, %v3281_v35 }
 0x455   : > { %v3391_v54 = vpop.f32.mrf.mxu2 }
 0x456   : > { %3774 = vmatmul.bf16.vlgmr.msrb.gmra.mxu1 %v5177_v34  ;;  %v3380_v39 = vadd.f32 %v3379_v17, %v3331_v38  ;;  %v5180_v17 = vld [vmem:[%s5577_s29 + $0x1d8] sm:$0xff] }
 0x458   : > { %v3451_v45 = vpack.c.bf16 %v3380_v39, %v3380_v39 }
 0x45a   : > { %v3500_v47 = vunpack.c.l.b16 %v3451_v45 }
 0x45b   : > { %v3283_v40 = vpop.f32.mrf.mxu1  ;;  %v3337_v41 = vpop.f32.mrf.mxu3 }
 0x45c   : > { %v3333_v42 = vadd.f32 %v3332_v33, %v3283_v40  ;;  %v5181_v33 = vld [vmem:[%s5577_s29 + $0x1e0] sm:$0xff] }
 0x45d   : > { %v3394_v62 = vpop.f32.mrf.mxu2 }
 0x45e   : > { %v3382_v43 = vadd.f32 %v3381_v27, %v3333_v42 }
 0x460   : > { %v3452_v46 = vpack.c.bf16 %v3382_v43, %v3382_v43  ;;  %4989 = vmatmul.msk.bf16.gmra.mxu3 %vm598_vm1, %v5587_v10 }
 0x462   : > { %v3501_v48 = vunpack.c.l.b16 %v3452_v46 }
 0x463   : > { %v3286_v50 = vpop.f32.mrf.mxu1  ;;  %v3340_v51 = vpop.f32.mrf.mxu3 }
 0x464   : > { %v3516_v52 = vpack.c.b16 %v3501_v48, %v3500_v47  ;;  %v3336_v53 = vadd.f32 %v3335_v36, %v3286_v50  ;;  %v5182_v48 = vld [vmem:[%s5577_s29 + $0x1e8] sm:$0xff] }
 0x465   : > { %v3396_v11 = vpop.f32.mrf.mxu2 }
 0x466   : > { %3725 = vmatmul.bf16.vlgmr.msrb.gmra.mxu0 %v3516_v52  ;;  %3779 = vmatmul.bf16.gmra.mxu1 %v5178_v49  ;;  %v3385_v55 = vadd.f32 %v3384_v32, %v3336_v53 }
 0x468   : > { %v3453_v60 = vpack.c.bf16 %v3385_v55, %v3385_v55 }
 0x46a   : > { %v3502_v63 = vunpack.c.l.b16 %v3453_v60 }
 0x46b   : > { %v3288_v56 = vpop.f32.mrf.mxu1  ;;  %v3342_v57 = vpop.f32.mrf.mxu3 }
 0x46c   : > { %v3338_v58 = vadd.f32 %v3337_v41, %v3288_v56 }
 0x46d   : > { %v3399_v22 = vpop.f32.mrf.mxu2 }
 0x46e   : > { %v3387_v59 = vadd.f32 %v3386_v37, %v3338_v58 }
 0x470   : > { %v3454_v61 = vpack.c.bf16 %v3387_v59, %v3387_v59  ;;  %4990 = vmatmul.msk.bf16.gmra.mxu3 %vm598_vm1, %v5587_v10 }
 0x472   : > { %v3503_v0 = vunpack.c.l.b16 %v3454_v61 }
 0x473   : > { %v3291_v2 = vpop.f32.mrf.mxu1  ;;  %v3345_v3 = vpop.f32.mrf.mxu3 }
 0x474   : > { %v3517_v4 = vpack.c.b16 %v3503_v0, %v3502_v63  ;;  %v3341_v5 = vadd.f32 %v3340_v51, %v3291_v2  ;;  %v5183_v0 = vld [vmem:[%s5577_s29 + $0x1f0] sm:$0xff] }
 0x475   : > { %v3401_v29 = vpop.f32.mrf.mxu2 }
 0x476   : > { %3730 = vmatmul.bf16.gmra.mxu0 %v3517_v4  ;;  %3784 = vmatmul.bf16.gmra.mxu1 %v5179_v1  ;;  %v3390_v6 = vadd.f32 %v3389_v44, %v3341_v5 }
 0x478   : > { %v3455_v13 = vpack.c.bf16 %v3390_v6, %v3390_v6 }
 0x47a   : > { %v3504_v15 = vunpack.c.l.b16 %v3455_v13 }
 0x47b   : > { %v3293_v7 = vpop.f32.mrf.mxu1  ;;  %v3347_v8 = vpop.f32.mrf.mxu3 }
 0x47c   : > { %v3343_v9 = vadd.f32 %v3342_v57, %v3293_v7 }
 0x47d   : > { %v3404_v39 = vpop.f32.mrf.mxu2 }
 0x47e   : > { %v3392_v12 = vadd.f32 %v3391_v54, %v3343_v9 }
 0x480   : > { %v3456_v14 = vpack.c.bf16 %v3392_v12, %v3392_v12  ;;  %4991 = vmatmul.msk.bf16.gmra.mxu3 %vm598_vm1, %v5587_v10 }
 0x482   : > { %v3505_v16 = vunpack.c.l.b16 %v3456_v14 }
 0x483   : > { %v3296_v18 = vpop.f32.mrf.mxu1  ;;  %v3350_v19 = vpop.f32.mrf.mxu3 }
 0x484   : > { %v3518_v20 = vpack.c.b16 %v3505_v16, %v3504_v15  ;;  %v3346_v21 = vadd.f32 %v3345_v3, %v3296_v18  ;;  %v5184_v15 = vld [vmem:[%s5577_s29 + $0x1f8] sm:$0xff] }
 0x485   : > { %v3406_v52 = vpop.f32.mrf.mxu2 }
 0x486   : > { %3735 = vmatmul.bf16.gmra.mxu0 %v3518_v20  ;;  %3789 = vmatmul.bf16.gmra.mxu1 %v5180_v17  ;;  %v3395_v23 = vadd.f32 %v3394_v62, %v3346_v21 }
 0x488   : > { %v3457_v28 = vpack.c.bf16 %v3395_v23, %v3395_v23 }
 0x48a   : > { %v3506_v31 = vunpack.c.l.b16 %v3457_v28 }
 0x48b   : > { %v3298_v24 = vpop.f32.mrf.mxu1  ;;  %v3352_v25 = vpop.f32.mrf.mxu3 }
 0x48c   : > { %v3348_v26 = vadd.f32 %v3347_v8, %v3298_v24 }
 0x48d   : > { %v3409_v60 = vpop.f32.mrf.mxu2 }
 0x48e   : > { %v3397_v27 = vadd.f32 %v3396_v11, %v3348_v26 }
 0x490   : > { %v3458_v30 = vpack.c.bf16 %v3397_v27, %v3397_v27  ;;  %4992 = vmatmul.msk.bf16.gmra.mxu3 %vm598_vm1, %v5587_v10 }
 0x492   : > { %v3507_v32 = vunpack.c.l.b16 %v3458_v30 }
 0x493   : > { %v3301_v34 = vpop.f32.mrf.mxu1  ;;  %v3355_v35 = vpop.f32.mrf.mxu3 }
 0x494   : > { %v3519_v36 = vpack.c.b16 %v3507_v32, %v3506_v31  ;;  %v3351_v37 = vadd.f32 %v3350_v19, %v3301_v34 }
 0x495   : > { %v3411_v5 = vpop.f32.mrf.mxu2 }
 0x496   : > { %3740 = vmatmul.bf16.gmra.mxu0 %v3519_v36  ;;  %3794 = vmatmul.bf16.gmra.mxu1 %v5181_v33  ;;  %v3400_v38 = vadd.f32 %v3399_v22, %v3351_v37 }
 0x498   : > { %v3459_v44 = vpack.c.bf16 %v3400_v38, %v3400_v38 }
 0x49a   : > { %v3508_v46 = vunpack.c.l.b16 %v3459_v44 }
 0x49b   : > { %v3303_v40 = vpop.f32.mrf.mxu1  ;;  %v3357_v41 = vpop.f32.mrf.mxu3 }
 0x49c   : > { %v3353_v42 = vadd.f32 %v3352_v25, %v3303_v40 }
 0x49d   : > { %v3414_v16 = vpop.f32.mrf.mxu2 }
 0x49e   : > { %v3402_v43 = vadd.f32 %v3401_v29, %v3353_v42 }
 0x4a0   : > { %v3460_v45 = vpack.c.bf16 %v3402_v43, %v3402_v43  ;;  %4993 = vmatmul.msk.bf16.gmra.mxu3 %vm598_vm1, %v5587_v10 }
 0x4a2   : > { %v3509_v47 = vunpack.c.l.b16 %v3460_v45 }
 0x4a3   : > { %v3306_v49 = vpop.f32.mrf.mxu1  ;;  %v3360_v50 = vpop.f32.mrf.mxu3 }
 0x4a4   : > { %v3520_v51 = vpack.c.b16 %v3509_v47, %v3508_v46  ;;  %v3356_v53 = vadd.f32 %v3355_v35, %v3306_v49 }
 0x4a5   : > { %v3416_v24 = vpop.f32.mrf.mxu2 }
 0x4a6   : > { %3745 = vmatmul.bf16.gmra.mxu0 %v3520_v51  ;;  %3799 = vmatmul.bf16.gmra.mxu1 %v5182_v48  ;;  %v3405_v54 = vadd.f32 %v3404_v39, %v3356_v53 }
 0x4a8   : > { %v3461_v59 = vpack.c.bf16 %v3405_v54, %v3405_v54 }
 0x4aa   : > { %v3510_v62 = vunpack.c.l.b16 %v3461_v59 }
 0x4ab   : > { %v3308_v55 = vpop.f32.mrf.mxu1  ;;  %v3362_v56 = vpop.f32.mrf.mxu3 }
 0x4ac   : > { %v3358_v57 = vadd.f32 %v3357_v41, %v3308_v55 }
 0x4ae   : > { %v3407_v58 = vadd.f32 %v3406_v52, %v3358_v57 }
 0x4b0   : > { %v3462_v61 = vpack.c.bf16 %v3407_v58, %v3407_v58  ;;  %4994 = vmatmul.msk.bf16.gmra.mxu3 %vm598_vm1, %v5587_v10 }
 0x4b2   : > { %v3511_v63 = vunpack.c.l.b16 %v3462_v61 }
 0x4b3   : > { %v3311_v1 = vpop.f32.mrf.mxu1  ;;  %v3365_v2 = vpop.f32.mrf.mxu3 }
 0x4b4   : > { %v3521_v3 = vpack.c.b16 %v3511_v63, %v3510_v62  ;;  %v3361_v4 = vadd.f32 %v3360_v50, %v3311_v1 }
 0x4b6   : > { %3750 = vmatmul.bf16.gmra.mxu0 %v3521_v3  ;;  %3804 = vmatmul.bf16.gmra.mxu1 %v5183_v0  ;;  %v3410_v6 = vadd.f32 %v3409_v60, %v3361_v4 }
 0x4b8   : > { %v3463_v12 = vpack.c.bf16 %v3410_v6, %v3410_v6 }
 0x4ba   : > { %v3512_v14 = vunpack.c.l.b16 %v3463_v12 }
 0x4bb   : > { %v3313_v7 = vpop.f32.mrf.mxu1  ;;  %v3367_v11 = vpop.f32.mrf.mxu3 }
 0x4bc   : > { %v3363_v8 = vadd.f32 %v3362_v56, %v3313_v7 }
 0x4be   : > { %v3412_v9 = vadd.f32 %v3411_v5, %v3363_v8 }
 0x4c0   : > { %v3464_v13 = vpack.c.bf16 %v3412_v9, %v3412_v9 }
 0x4c2   : > { %v3513_v10 = vunpack.c.l.b16 %v3464_v13 }
 0x4c3   : > { %v3316_v17 = vpop.f32.mrf.mxu1  ;;  %v3824_v20 = vpop.f32.mrf.mxu3 }
 0x4c4   : > { %v3522_v18 = vpack.c.b16 %v3513_v10, %v3512_v14  ;;  %v3366_v19 = vadd.f32 %v3365_v2, %v3316_v17 }
 0x4c6   : > { %3755 = vmatmul.bf16.gmra.mxu0 %v3522_v18  ;;  %3809 = vmatmul.bf16.gmra.mxu1 %v5184_v15  ;;  %v3415_v21 = vadd.f32 %v3414_v16, %v3366_v19 }
 0x4c8   : > { %v3465_v26 = vpack.c.bf16 %v3415_v21, %v3415_v21 }
 0x4ca   : > { %v3514_v29 = vunpack.c.l.b16 %v3465_v26 }
 0x4cb   : > { %v3318_v22 = vpop.f32.mrf.mxu1  ;;  %v3826_v28 = vpop.f32.mrf.mxu3 }
 0x4cc   : > { %v3368_v23 = vadd.f32 %v3367_v11, %v3318_v22 }
 0x4ce   : > { %v3417_v25 = vadd.f32 %v3416_v24, %v3368_v23 }
 0x4d0   : > { %v3466_v27 = vpack.c.bf16 %v3417_v25, %v3417_v25 }
 0x4d2   : > { %v3515_v30 = vunpack.c.l.b16 %v3466_v27 }
 0x4d3   : > { %v3775_v31 = vpop.f32.mrf.mxu1  ;;  %v3829_v33 = vpop.f32.mrf.mxu3 }
 0x4d4   : > { %v3523_v32 = vpack.c.b16 %v3515_v30, %v3514_v29 }
 0x4d6   : > { %3760 = vmatmul.bf16.gmra.mxu0 %v3523_v32 }
 0x4db   : > { %v3777_v34 = vpop.f32.mrf.mxu1  ;;  %v3831_v38 = vpop.f32.mrf.mxu3 }
 0x4e3   : > { %v3726_v35 = vpop.f32.mrf.mxu0  ;;  %v3780_v36 = vpop.f32.mrf.mxu1 }
 0x4e4   : > { %v3776_v37 = vadd.f32 %v3775_v31, %v3726_v35  ;;  %v3834_v44 = vpop.f32.mrf.mxu3 }
 0x4e6   : > { %v3825_v39 = vadd.f32 %v3824_v20, %v3776_v37 }
 0x4e8   : > { %3864 = vst [vmem:[%s5799_s23] sm:$0xff] %v3825_v39 }
 0x4eb   : > { %v3728_v40 = vpop.f32.mrf.mxu0  ;;  %v3782_v41 = vpop.f32.mrf.mxu1 }
 0x4ec   : > { %v3778_v42 = vadd.f32 %v3777_v34, %v3728_v40  ;;  %v3836_v49 = vpop.f32.mrf.mxu3 }
 0x4ee   : > { %v3827_v43 = vadd.f32 %v3826_v28, %v3778_v42 }
 0x4f0   : > { %3865 = vst [vmem:[%s5799_s23 + $0x8] sm:$0xff] %v3827_v43 }
 0x4f3   : > { %v3731_v45 = vpop.f32.mrf.mxu0  ;;  %v3785_v46 = vpop.f32.mrf.mxu1 }
 0x4f4   : > { %v3781_v47 = vadd.f32 %v3780_v36, %v3731_v45  ;;  %v3839_v54 = vpop.f32.mrf.mxu3 }
 0x4f6   : > { %v3830_v48 = vadd.f32 %v3829_v33, %v3781_v47 }
 0x4f8   : > { %3866 = vst [vmem:[%s5799_s23 + $0x10] sm:$0xff] %v3830_v48 }
 0x4fb   : > { %v3733_v50 = vpop.f32.mrf.mxu0  ;;  %v3787_v51 = vpop.f32.mrf.mxu1 }
 0x4fc   : > { %v3783_v52 = vadd.f32 %v3782_v41, %v3733_v50  ;;  %v3841_v62 = vpop.f32.mrf.mxu3 }
 0x4fe   : > { %v3832_v53 = vadd.f32 %v3831_v38, %v3783_v52 }
 0x500   : > { %3867 = vst [vmem:[%s5799_s23 + $0x18] sm:$0xff] %v3832_v53 }
 0x503   : > { %v3736_v55 = vpop.f32.mrf.mxu0  ;;  %v3790_v56 = vpop.f32.mrf.mxu1 }
 0x504   : > { %v3786_v57 = vadd.f32 %v3785_v46, %v3736_v55  ;;  %v3844_v4 = vpop.f32.mrf.mxu3 }
 0x506   : > { %v3835_v58 = vadd.f32 %v3834_v44, %v3786_v57 }
 0x508   : > { %3868 = vst [vmem:[%s5799_s23 + $0x20] sm:$0xff] %v3835_v58 }
 0x50b   : > { %v3738_v59 = vpop.f32.mrf.mxu0  ;;  %v3792_v60 = vpop.f32.mrf.mxu1 }
 0x50c   : > { %v3788_v61 = vadd.f32 %v3787_v51, %v3738_v59  ;;  %v3846_v9 = vpop.f32.mrf.mxu3 }
 0x50e   : > { %v3837_v63 = vadd.f32 %v3836_v49, %v3788_v61 }
 0x510   : > { %3869 = vst [vmem:[%s5799_s23 + $0x28] sm:$0xff] %v3837_v63 }
 0x513   : > { %v3741_v0 = vpop.f32.mrf.mxu0  ;;  %v3795_v2 = vpop.f32.mrf.mxu1 }
 0x514   : > { %v3791_v1 = vadd.f32 %v3790_v56, %v3741_v0  ;;  %v3849_v15 = vpop.f32.mrf.mxu3 }
 0x516   : > { %v3840_v3 = vadd.f32 %v3839_v54, %v3791_v1 }
 0x518   : > { %3870 = vst [vmem:[%s5799_s23 + $0x30] sm:$0xff] %v3840_v3 }
 0x51b   : > { %v3743_v5 = vpop.f32.mrf.mxu0  ;;  %v3797_v8 = vpop.f32.mrf.mxu1 }
 0x51c   : > { %v3793_v6 = vadd.f32 %v3792_v60, %v3743_v5  ;;  %v3851_v21 = vpop.f32.mrf.mxu3 }
 0x51e   : > { %v3842_v7 = vadd.f32 %v3841_v62, %v3793_v6 }
 0x520   : > { %3871 = vst [vmem:[%s5799_s23 + $0x38] sm:$0xff] %v3842_v7 }
 0x523   : > { %v3746_v11 = vpop.f32.mrf.mxu0  ;;  %v3800_v14 = vpop.f32.mrf.mxu1 }
 0x524   : > { %v3796_v12 = vadd.f32 %v3795_v2, %v3746_v11  ;;  %v3854_v27 = vpop.f32.mrf.mxu3 }
 0x526   : > { %v3845_v13 = vadd.f32 %v3844_v4, %v3796_v12 }
 0x528   : > { %3872 = vst [vmem:[%s5799_s23 + $0x40] sm:$0xff] %v3845_v13 }
 0x52b   : > { %v3748_v10 = vpop.f32.mrf.mxu0  ;;  %v3802_v19 = vpop.f32.mrf.mxu1 }
 0x52c   : > { %v3798_v16 = vadd.f32 %v3797_v8, %v3748_v10  ;;  %v3856_v32 = vpop.f32.mrf.mxu3 }
 0x52e   : > { %v3847_v17 = vadd.f32 %v3846_v9, %v3798_v16 }
 0x530   : > { %3873 = vst [vmem:[%s5799_s23 + $0x48] sm:$0xff] %v3847_v17 }
 0x533   : > { %v3751_v18 = vpop.f32.mrf.mxu0  ;;  %v3805_v25 = vpop.f32.mrf.mxu1 }
 0x534   : > { %v3801_v20 = vadd.f32 %v3800_v14, %v3751_v18  ;;  %v3859_v37 = vpop.f32.mrf.mxu3 }
 0x536   : > { %v3850_v22 = vadd.f32 %v3849_v15, %v3801_v20 }
 0x538   : > { %3874 = vst [vmem:[%s5799_s23 + $0x50] sm:$0xff] %v3850_v22 }
 0x53b   : > { %v3753_v23 = vpop.f32.mrf.mxu0  ;;  %v3807_v31 = vpop.f32.mrf.mxu1 }
 0x53c   : > { %v3803_v24 = vadd.f32 %v3802_v19, %v3753_v23  ;;  %v3861_v44 = vpop.f32.mrf.mxu3 }
 0x53e   : > { %v3852_v26 = vadd.f32 %v3851_v21, %v3803_v24 }
 0x540   : > { %3875 = vst [vmem:[%s5799_s23 + $0x58] sm:$0xff] %v3852_v26 }
 0x543   : > { %v3756_v28 = vpop.f32.mrf.mxu0  ;;  %v3810_v36 = vpop.f32.mrf.mxu1 }
 0x544   : > { %v3806_v29 = vadd.f32 %v3805_v25, %v3756_v28 }
 0x546   : > { %v3855_v30 = vadd.f32 %v3854_v27, %v3806_v29 }
 0x548   : > { %3876 = vst [vmem:[%s5799_s23 + $0x60] sm:$0xff] %v3855_v30 }
 0x54b   : > { %v3758_v33 = vpop.f32.mrf.mxu0  ;;  %v3812_v41 = vpop.f32.mrf.mxu1 }
 0x54c   : > { %v3808_v34 = vadd.f32 %v3807_v31, %v3758_v33 }
 0x54e   : > { %v3857_v35 = vadd.f32 %v3856_v32, %v3808_v34 }
 0x550   : > { %3877 = vst [vmem:[%s5799_s23 + $0x68] sm:$0xff] %v3857_v35 }
 0x553   : > { %v3761_v38 = vpop.f32.mrf.mxu0 }
 0x554   : > { %v3811_v39 = vadd.f32 %v3810_v36, %v3761_v38 }
 0x556   : > { %v3860_v40 = vadd.f32 %v3859_v37, %v3811_v39 }
 0x558   : > { %3878 = vst [vmem:[%s5799_s23 + $0x70] sm:$0xff] %v3860_v40 }
 0x55b   : > { %v3763_v42 = vpop.f32.mrf.mxu0 }
 0x55c   : > { %v3813_v43 = vadd.f32 %v3812_v41, %v3763_v42 }
 0x55e   : > { %v3862_v45 = vadd.f32 %v3861_v44, %v3813_v43 }
 0x560   : > { %3879 = vst [vmem:[%s5799_s23 + $0x78] sm:$0xff] %v3862_v45 }
 0x561   : > { %5362 = shalt.err (!%p5359_p8)
}
 0x562   : > { %s5423_s4 = smov 128   ;;  %s5424_s22 = smov 8  }
 0x563   : > { %5218 = dma.vmem_to_hbm [thread:$0]  (%p5497_p11), %s3894_s8, 2048, %s3896_s9, %s3881_s17, %s5423_s4, %s5423_s4, %s5424_s22  }
 0x564 PF: > { %s3910_s26 = sand.u32 1, %s5397_s12   ;;  %p5225_p9 = pnand %p4004_p2, %p5501_p12 }
 0x565   : > { %s3911_s11 = scalar_lea.sflag [#allocation4], %s3910_s26 }
 0x566   : > { %p5226_p10 = pneg %p5225_p9 }
 0x568   : > { %5392 = dma.done.wait (%p5226_p10), %s3911_s11, 2048  }
 0x569   : > { %5394 = vsyncadd (%p5226_p10), %s3911_s11, 4294965248  ;;  %p19_p1 = scmp.ge.s32.totalorder %s5470_s18, 4   ;;  %s5862_s12 = smov %s5401_s13 }
 0x56a   : > { %s5863_s13 = smov %s5405_s14  ;;  %s5864_s14 = smov %s5482_s21 }
 0x56b   : > { %s5865_s15 = smov %s5470_s18  ;;  %21 = sbr.rel (!%p19_p1) target bundleno = 9 (0x9), region = 113 }
 0x570   :  { %3917 = vsyncpa [#allocation3], 1 }
 0x571   :  { %3919 = vsyncpa [#allocation3 + $0x1], 1 }
 0x572   :  { %3920 = vsyncpa [#allocation6], 1 }
 0x573   :  { %3922 = vsyncpa [#allocation6 + $0x1], 1 }
 0x574   :  { %3923 = vsyncpa [#allocation4], 1 }
 0x575   :  { %3925 = vsyncpa [#allocation4 + $0x1], 1 }

</bundles_post_ra>
